<compile_context>
chip_gen: v5e
topology: v5e:2x2
jax: 0.10.0
libtpu: 0.0.40
codegen_flags: <defaults>
</compile_context>

<pallas_src>
import jax
import jax.numpy as jnp
from jax.experimental import pallas as pl
from jax.experimental.pallas import tpu as pltpu

# ---------------- problem sizes (small, consistent with the module) -----------
B = 2            # batch_size
R = 32           # num_boxes (rois per image)
H = 128          # fc7 hidden size (4096 in the real VGG16 head)
NC = 20          # n_classes
NC1 = NC + 1     # n_classes + 1 (ic heads)
EPS = 1e-6

C_TOT = 128      # lane-dense padded width for weights / output slab

# --- fused weight slab column layout (logits) ---
W_IC0 = 0                 # ic_score     : [0, 21)
W_IC1 = NC1               # ic_score1    : [21, 42)
W_IC2 = 2 * NC1           # ic_score2    : [42, 63)
W_M0 = 3 * NC1            # midn_score0  : [63, 83)
W_M1 = 3 * NC1 + NC       # midn_score1  : [83, 103)
W_USED = 3 * NC1 + 2 * NC  # 103 (cols 103:128 are zero padding)

# --- packed output slab column layout (probabilities) ---
O_IC0 = 0                 # ic_prob      : [0, 21)
O_IC1 = NC1               # ic_prob1     : [21, 42)
O_IC2 = 2 * NC1           # ic_prob2     : [42, 63)
O_MIDN = 3 * NC1          # midn_prob    : [63, 83)
O_AVG = 3 * NC1 + NC      # (ic+ic1+ic2)/3 : [83, 104)
O_USED = O_AVG + NC1      # 104 (cols 104:128 are zero padding)


# ---------------- fused kernel -------------------------------------------------
def _oicr_fused_kernel(fc7_ref, w_ref, b_ref,
                       labels_ref, labels_ic_ref, wgt_ref,
                       slab_ref, losses_ref):
    # ---- single lane-dense head matmul: (B*R, H) @ (H, 128) ----
    x = fc7_ref[...].reshape(B * R, H)                               # (64, 128)
    logits = jnp.dot(x, w_ref[...],
                     preferred_element_type=jnp.float32) + b_ref[...]  # (64, 128)
    logits = logits.reshape(B, R, C_TOT)                             # (B, R, 128)

    def softmax_classes(z):                    # softmax over dim=2 (classes)
        m = jnp.max(z, axis=-1, keepdims=True)
        e = jnp.exp(z - m)
        return e * pl.reciprocal(jnp.sum(e, axis=-1, keepdims=True), approx=True)

    def softmax_boxes(z):                      # softmax over dim=1 (boxes, per batch)
        m = jnp.max(z, axis=1, keepdims=True)
        e = jnp.exp(z - m)
        return e * pl.reciprocal(jnp.sum(e, axis=1, keepdims=True), approx=True)

    p_ic = softmax_classes(logits[:, :, W_IC0:W_IC0 + NC1])          # (B, R, 21)
    p_ic1 = softmax_classes(logits[:, :, W_IC1:W_IC1 + NC1])
    p_ic2 = softmax_classes(logits[:, :, W_IC2:W_IC2 + NC1])
    p_m0 = softmax_boxes(logits[:, :, W_M0:W_M0 + NC])               # (B, R, 20)
    p_m1 = softmax_classes(logits[:, :, W_M1:W_M1 + NC])
    midn = p_m0 * p_m1                                               # (B, R, 20)
    avg = (p_ic + p_ic1 + p_ic2) * (1.0 / 3.0)                       # ret_prob

    # ---- packed, lane-dense output slab ----
    slab_ref[:, :, O_IC0:O_IC0 + NC1] = p_ic
    slab_ref[:, :, O_IC1:O_IC1 + NC1] = p_ic1
    slab_ref[:, :, O_IC2:O_IC2 + NC1] = p_ic2
    slab_ref[:, :, O_MIDN:O_MIDN + NC] = midn
    slab_ref[:, :, O_AVG:O_AVG + NC1] = avg
    slab_ref[:, :, O_USED:] = jnp.zeros((B, R, C_TOT - O_USED), jnp.float32)

    # ---- loss_midn: multi_class_cross_entropy_loss(global_pool, labels) ----
    gp = jnp.sum(midn, axis=1)                                       # (B, NC)
    lbl = labels_ref[...]                                            # (B, NC)
    ce = lbl * jnp.log(gp + EPS) + (1.0 - lbl) * jnp.log(1.0 - gp + EPS)
    loss_midn = -jnp.sum(ce) * (1.0 / B)          # mean over batch of per-image sums

    # ---- WeightedSoftmaxWithLoss for each refinement stage ----
    def wswl(p, lic, w):
        l = jnp.sum(lic * jnp.log(p + EPS), axis=2)                  # (B, R)
        l = -w * l
        return jnp.sum(l) * (1.0 / (B * R))

    losses_ref[0] = loss_midn
    losses_ref[1] = wswl(p_ic, labels_ic_ref[0], wgt_ref[0])
    losses_ref[2] = wswl(p_ic1, labels_ic_ref[1], wgt_ref[1])
    losses_ref[3] = wswl(p_ic2, labels_ic_ref[2], wgt_ref[2])


# ---------------- wrapper ------------------------------------------------------
def oicr_forward(fc7, w_cat, b_cat, labels, labels_ic3, cls_loss_weights3):
    """Fused _OICR forward.

    Returns (ic_prob, ic_prob1, ic_prob2, ret_prob, midn_prob,
             loss_midn, (loss_oicr, loss_oicr1, loss_oicr2)).
    """
    vmem = pl.BlockSpec(memory_space=pltpu.MemorySpace.VMEM)
    smem = pl.BlockSpec(memory_space=pltpu.MemorySpace.SMEM)

    slab, losses = pl.pallas_call(
        _oicr_fused_kernel,
        out_shape=(
            jax.ShapeDtypeStruct((B, R, C_TOT), jnp.float32),   # packed probabilities
            jax.ShapeDtypeStruct((4,), jnp.float32),            # 4 scalar losses
        ),
        in_specs=[vmem, vmem, vmem, vmem, vmem, vmem],
        out_specs=(vmem, smem),
    )(fc7, w_cat, b_cat, labels, labels_ic3, cls_loss_weights3)

    ic_prob = slab[:, :, O_IC0:O_IC0 + NC1]
    ic_prob1 = slab[:, :, O_IC1:O_IC1 + NC1]
    ic_prob2 = slab[:, :, O_IC2:O_IC2 + NC1]
    midn_prob = slab[:, :, O_MIDN:O_MIDN + NC]
    ret_prob = slab[:, :, O_AVG:O_AVG + NC1]
    loss_midn = losses[0]
    oicr_losses = (losses[1], losses[2], losses[3])
    return ic_prob, ic_prob1, ic_prob2, ret_prob, midn_prob, loss_midn, oicr_losses


# ---------------- parameters ---------------------------------------------------
def init_params(key):
    """normal_init(mean=0, std=0.01) on weights, zero biases (as in _init_weights)."""
    ks = jax.random.split(key, 5)

    def head(k, c):
        w = 0.01 * jax.random.normal(k, (H, c), dtype=jnp.float32)
        b = jnp.zeros((1, c), dtype=jnp.float32)
        return w, b

    w_ic, b_ic = head(ks[0], NC1)
    w_ic1, b_ic1 = head(ks[1], NC1)
    w_ic2, b_ic2 = head(ks[2], NC1)
    w_m0, b_m0 = head(ks[3], NC)
    w_m1, b_m1 = head(ks[4], NC)
    return (w_ic, b_ic, w_ic1, b_ic1, w_ic2, b_ic2, w_m0, b_m0, w_m1, b_m1)


def pack_params(params):
    """Concatenate the 5 heads into one lane-dense (H, 128) weight / (1, 128) bias slab."""
    (w_ic, b_ic, w_ic1, b_ic1, w_ic2, b_ic2, w_m0, b_m0, w_m1, b_m1) = params
    pad_w = jnp.zeros((H, C_TOT - W_USED), jnp.float32)
    pad_b = jnp.zeros((1, C_TOT - W_USED), jnp.float32)
    w_cat = jnp.concatenate([w_ic, w_ic1, w_ic2, w_m0, w_m1, pad_w], axis=1)
    b_cat = jnp.concatenate([b_ic, b_ic1, b_ic2, b_m0, b_m1, pad_b], axis=1)
    return w_cat, b_cat


# ---------------- pure-JAX reference (for correctness check) --------------------
def reference_forward(fc7, params, labels, labels_ic3, wgt3):
    (w_ic, b_ic, w_ic1, b_ic1, w_ic2, b_ic2, w_m0, b_m0, w_m1, b_m1) = params
    x = fc7.reshape(B * R, H)

    def lin(w, b):
        return (x @ w + b).reshape(B, R, -1)

    p_ic = jax.nn.softmax(lin(w_ic, b_ic), axis=2)
    p_ic1 = jax.nn.softmax(lin(w_ic1, b_ic1), axis=2)
    p_ic2 = jax.nn.softmax(lin(w_ic2, b_ic2), axis=2)
    p_m0 = jax.nn.softmax(lin(w_m0, b_m0), axis=1)
    p_m1 = jax.nn.softmax(lin(w_m1, b_m1), axis=2)
    midn = p_m0 * p_m1
    gp = midn.sum(axis=1)
    ce = labels * jnp.log(gp + EPS) + (1.0 - labels) * jnp.log(1.0 - gp + EPS)
    loss_midn = -jnp.mean(jnp.sum(ce, axis=1))

    def wswl(p, lic, w):
        l = jnp.sum(lic * jnp.log(p + EPS), axis=2)
        l = -w * l
        return jnp.sum(l) / l.size

    losses = (wswl(p_ic, labels_ic3[0], wgt3[0]),
              wswl(p_ic1, labels_ic3[1], wgt3[1]),
              wswl(p_ic2, labels_ic3[2], wgt3[2]))
    ret_prob = (p_ic + p_ic1 + p_ic2) / 3.0
    return p_ic, p_ic1, p_ic2, ret_prob, midn, loss_midn, losses


# ---------------- main ----------------------------------------------------------
if __name__ == "__main__":
    key = jax.random.PRNGKey(0)
    k_fc7, k_par, k_lab, k_ic, k_w = jax.random.split(key, 5)

    fc7 = jax.random.normal(k_fc7, (B, R, H), dtype=jnp.float32)
    params = init_params(k_par)
    w_cat, b_cat = pack_params(params)

    # synthetic supervision (OICRLayer is an external CPU/CUDA op); one set of
    # stage-specific pseudo labels / weights per refinement branch.
    labels = (jax.random.uniform(k_lab, (B, NC)) > 0.7).astype(jnp.float32)
    ic_keys = jax.random.split(k_ic, 3)
    labels_ic3 = jnp.stack([
        jax.nn.one_hot(jax.random.randint(ic_keys[s], (B, R), 0, NC1), NC1,
                       dtype=jnp.float32)
        for s in range(3)
    ], axis=0)                                                       # (3, B, R, NC1)
    w_keys = jax.random.split(k_w, 3)
    cls_loss_weights3 = jnp.stack([
        jax.random.uniform(w_keys[s], (B, R), dtype=jnp.float32) for s in range(3)
    ], axis=0)                                                       # (3, B, R)

    outs = oicr_forward(fc7, w_cat, b_cat, labels, labels_ic3, cls_loss_weights3)
    outs = jax.block_until_ready(outs)
    ic_prob, ic_prob1, ic_prob2, ret_prob, midn_prob, loss_midn, oicr_losses = outs

    # ---- sanity checks (tolerances account for approx EUP reciprocal) ----
    assert ic_prob.shape == (B, R, NC1) and midn_prob.shape == (B, R, NC)
    assert jnp.allclose(jnp.sum(ic_prob, axis=2), 1.0, atol=5e-3)
    assert jnp.allclose(jnp.sum(ic_prob1, axis=2), 1.0, atol=5e-3)
    assert jnp.allclose(jnp.sum(ic_prob2, axis=2), 1.0, atol=5e-3)
    assert bool(jnp.isfinite(loss_midn)) and all(bool(jnp.isfinite(l)) for l in oicr_losses)

    # ---- compare against pure-JAX reference ----
    ref = reference_forward(fc7, params, labels, labels_ic3, cls_loss_weights3)
    r_ic, r_ic1, r_ic2, r_ret, r_midn, r_lm, r_losses = ref
    assert jnp.allclose(ic_prob, r_ic, atol=5e-3)
    assert jnp.allclose(ic_prob1, r_ic1, atol=5e-3)
    assert jnp.allclose(ic_prob2, r_ic2, atol=5e-3)
    assert jnp.allclose(ret_prob, r_ret, atol=5e-3)
    assert jnp.allclose(midn_prob, r_midn, atol=5e-3)
    assert jnp.allclose(loss_midn, r_lm, rtol=3e-2, atol=3e-2)
    for got, want in zip(oicr_losses, r_losses):
        assert jnp.allclose(got, want, rtol=3e-2, atol=3e-2)

    print("KERNEL_OK")
</pallas_src>

<mosaic_0001>
module attributes {stable_mosaic.version = 11 : i64} {
  func.func @_oicr_fused_kernel(%arg0: memref<2x32x128xf32, #tpu.memory_space<vmem>>, %arg1: memref<128x128xf32, #tpu.memory_space<vmem>>, %arg2: memref<1x128xf32, #tpu.memory_space<vmem>>, %arg3: memref<2x20xf32, #tpu.memory_space<vmem>>, %arg4: memref<3x2x32x21xf32, #tpu.memory_space<vmem>>, %arg5: memref<3x2x32xf32, #tpu.memory_space<vmem>>, %arg6: memref<2x32x128xf32, #tpu.memory_space<vmem>>, %arg7: memref<4xf32, #tpu.memory_space<smem>>) attributes {dimension_semantics = [], scalar_prefetch = 0 : i64, scratch_operands = 0 : i64, tpu.core_type = #tpu.core_type<tc>} {
    %c0 = arith.constant 0 : index
    %c0_0 = arith.constant 0 : index
    %c0_1 = arith.constant 0 : index
    %0 = vector.load %arg0[%c0, %c0_0, %c0_1] : memref<2x32x128xf32, #tpu.memory_space<vmem>>, vector<2x32x128xf32>
    %1 = vector.shape_cast %0 : vector<2x32x128xf32> to vector<64x128xf32>
    %c0_2 = arith.constant 0 : index
    %c0_3 = arith.constant 0 : index
    %2 = vector.load %arg1[%c0_2, %c0_3] : memref<128x128xf32, #tpu.memory_space<vmem>>, vector<128x128xf32>
    %cst = arith.constant dense<0.000000e+00> : vector<64x128xf32>
    %3 = tpu.matmul %1, %2, %cst {dimension_numbers = #tpu.dot_dimension_numbers<[1], [0], [0], [1], [0, 0, 1, 1], [], []>} : vector<64x128xf32>, vector<128x128xf32>, vector<64x128xf32> -> vector<64x128xf32>
    %c0_4 = arith.constant 0 : index
    %c0_5 = arith.constant 0 : index
    %4 = vector.load %arg2[%c0_4, %c0_5] : memref<1x128xf32, #tpu.memory_space<vmem>>, vector<1x128xf32>
    %5 = vector.broadcast %4 : vector<1x128xf32> to vector<64x128xf32>
    %6 = arith.addf %3, %5 : vector<64x128xf32>
    %7 = vector.shape_cast %6 : vector<64x128xf32> to vector<2x32x128xf32>
    %8 = vector.extract_strided_slice %7 {offsets = [0, 0, 0], sizes = [2, 32, 21], strides = [1, 1, 1]} : vector<2x32x128xf32> to vector<2x32x21xf32>
    %cst_6 = arith.constant dense<0xFF800000> : vector<2x32xf32>
    %9 = vector.multi_reduction <maximumf>, %8, %cst_6 [2] : vector<2x32x21xf32> to vector<2x32xf32>
    %10 = vector.shape_cast %9 : vector<2x32xf32> to vector<2x32x1xf32>
    %11 = vector.broadcast %10 : vector<2x32x1xf32> to vector<2x32x21xf32>
    %12 = arith.subf %8, %11 : vector<2x32x21xf32>
    %13 = math.exp %12 : vector<2x32x21xf32>
    %cst_7 = arith.constant dense<0.000000e+00> : vector<2x32xf32>
    %14 = vector.multi_reduction <add>, %13, %cst_7 [2] : vector<2x32x21xf32> to vector<2x32xf32>
    %15 = vector.shape_cast %14 : vector<2x32xf32> to vector<2x32x1xf32>
    %16 = tpu.reciprocal %15 {approx = true} : vector<2x32x1xf32> -> vector<2x32x1xf32>
    %17 = vector.broadcast %16 : vector<2x32x1xf32> to vector<2x32x21xf32>
    %18 = arith.mulf %13, %17 : vector<2x32x21xf32>
    %19 = vector.extract_strided_slice %7 {offsets = [0, 0, 21], sizes = [2, 32, 21], strides = [1, 1, 1]} : vector<2x32x128xf32> to vector<2x32x21xf32>
    %cst_8 = arith.constant dense<0xFF800000> : vector<2x32xf32>
    %20 = vector.multi_reduction <maximumf>, %19, %cst_8 [2] : vector<2x32x21xf32> to vector<2x32xf32>
    %21 = vector.shape_cast %20 : vector<2x32xf32> to vector<2x32x1xf32>
    %22 = vector.broadcast %21 : vector<2x32x1xf32> to vector<2x32x21xf32>
    %23 = arith.subf %19, %22 : vector<2x32x21xf32>
    %24 = math.exp %23 : vector<2x32x21xf32>
    %cst_9 = arith.constant dense<0.000000e+00> : vector<2x32xf32>
    %25 = vector.multi_reduction <add>, %24, %cst_9 [2] : vector<2x32x21xf32> to vector<2x32xf32>
    %26 = vector.shape_cast %25 : vector<2x32xf32> to vector<2x32x1xf32>
    %27 = tpu.reciprocal %26 {approx = true} : vector<2x32x1xf32> -> vector<2x32x1xf32>
    %28 = vector.broadcast %27 : vector<2x32x1xf32> to vector<2x32x21xf32>
    %29 = arith.mulf %24, %28 : vector<2x32x21xf32>
    %30 = vector.extract_strided_slice %7 {offsets = [0, 0, 42], sizes = [2, 32, 21], strides = [1, 1, 1]} : vector<2x32x128xf32> to vector<2x32x21xf32>
    %cst_10 = arith.constant dense<0xFF800000> : vector<2x32xf32>
    %31 = vector.multi_reduction <maximumf>, %30, %cst_10 [2] : vector<2x32x21xf32> to vector<2x32xf32>
    %32 = vector.shape_cast %31 : vector<2x32xf32> to vector<2x32x1xf32>
    %33 = vector.broadcast %32 : vector<2x32x1xf32> to vector<2x32x21xf32>
    %34 = arith.subf %30, %33 : vector<2x32x21xf32>
    %35 = math.exp %34 : vector<2x32x21xf32>
    %cst_11 = arith.constant dense<0.000000e+00> : vector<2x32xf32>
    %36 = vector.multi_reduction <add>, %35, %cst_11 [2] : vector<2x32x21xf32> to vector<2x32xf32>
    %37 = vector.shape_cast %36 : vector<2x32xf32> to vector<2x32x1xf32>
    %38 = tpu.reciprocal %37 {approx = true} : vector<2x32x1xf32> -> vector<2x32x1xf32>
    %39 = vector.broadcast %38 : vector<2x32x1xf32> to vector<2x32x21xf32>
    %40 = arith.mulf %35, %39 : vector<2x32x21xf32>
    %41 = vector.extract_strided_slice %7 {offsets = [0, 0, 63], sizes = [2, 32, 20], strides = [1, 1, 1]} : vector<2x32x128xf32> to vector<2x32x20xf32>
    %cst_12 = arith.constant dense<0xFF800000> : vector<2x20xf32>
    %42 = vector.multi_reduction <maximumf>, %41, %cst_12 [1] : vector<2x32x20xf32> to vector<2x20xf32>
    %43 = vector.shape_cast %42 : vector<2x20xf32> to vector<2x1x20xf32>
    %44 = vector.broadcast %43 : vector<2x1x20xf32> to vector<2x32x20xf32>
    %45 = arith.subf %41, %44 : vector<2x32x20xf32>
    %46 = math.exp %45 : vector<2x32x20xf32>
    %cst_13 = arith.constant dense<0.000000e+00> : vector<2x20xf32>
    %47 = vector.multi_reduction <add>, %46, %cst_13 [1] : vector<2x32x20xf32> to vector<2x20xf32>
    %48 = vector.shape_cast %47 : vector<2x20xf32> to vector<2x1x20xf32>
    %49 = tpu.reciprocal %48 {approx = true} : vector<2x1x20xf32> -> vector<2x1x20xf32>
    %50 = vector.broadcast %49 : vector<2x1x20xf32> to vector<2x32x20xf32>
    %51 = arith.mulf %46, %50 : vector<2x32x20xf32>
    %52 = vector.extract_strided_slice %7 {offsets = [0, 0, 83], sizes = [2, 32, 20], strides = [1, 1, 1]} : vector<2x32x128xf32> to vector<2x32x20xf32>
    %cst_14 = arith.constant dense<0xFF800000> : vector<2x32xf32>
    %53 = vector.multi_reduction <maximumf>, %52, %cst_14 [2] : vector<2x32x20xf32> to vector<2x32xf32>
    %54 = vector.shape_cast %53 : vector<2x32xf32> to vector<2x32x1xf32>
    %55 = vector.broadcast %54 : vector<2x32x1xf32> to vector<2x32x20xf32>
    %56 = arith.subf %52, %55 : vector<2x32x20xf32>
    %57 = math.exp %56 : vector<2x32x20xf32>
    %cst_15 = arith.constant dense<0.000000e+00> : vector<2x32xf32>
    %58 = vector.multi_reduction <add>, %57, %cst_15 [2] : vector<2x32x20xf32> to vector<2x32xf32>
    %59 = vector.shape_cast %58 : vector<2x32xf32> to vector<2x32x1xf32>
    %60 = tpu.reciprocal %59 {approx = true} : vector<2x32x1xf32> -> vector<2x32x1xf32>
    %61 = vector.broadcast %60 : vector<2x32x1xf32> to vector<2x32x20xf32>
    %62 = arith.mulf %57, %61 : vector<2x32x20xf32>
    %63 = arith.mulf %51, %62 : vector<2x32x20xf32>
    %64 = arith.addf %18, %29 : vector<2x32x21xf32>
    %65 = arith.addf %64, %40 : vector<2x32x21xf32>
    %cst_16 = arith.constant 0.333333343 : f32
    %66 = vector.broadcast %cst_16 : f32 to vector<2x32x21xf32>
    %67 = arith.mulf %65, %66 : vector<2x32x21xf32>
    %c0_17 = arith.constant 0 : index
    %c0_18 = arith.constant 0 : index
    %c0_19 = arith.constant 0 : index
    %68 = vector.load %arg6[%c0_17, %c0_18, %c0_19] : memref<2x32x128xf32, #tpu.memory_space<vmem>>, vector<2x32x21xf32>
    tpu.vector_store %arg6[%c0_17, %c0_18, %c0_19], %18 {strides = array<i32>} : memref<2x32x128xf32, #tpu.memory_space<vmem>>, vector<2x32x21xf32>,
    %c0_20 = arith.constant 0 : index
    %c0_21 = arith.constant 0 : index
    %c21 = arith.constant 21 : index
    %69 = vector.load %arg6[%c0_20, %c0_21, %c21] : memref<2x32x128xf32, #tpu.memory_space<vmem>>, vector<2x32x21xf32>
    tpu.vector_store %arg6[%c0_20, %c0_21, %c21], %29 {strides = array<i32>} : memref<2x32x128xf32, #tpu.memory_space<vmem>>, vector<2x32x21xf32>,
    %c0_22 = arith.constant 0 : index
    %c0_23 = arith.constant 0 : index
    %c42 = arith.constant 42 : index
    %70 = vector.load %arg6[%c0_22, %c0_23, %c42] : memref<2x32x128xf32, #tpu.memory_space<vmem>>, vector<2x32x21xf32>
    tpu.vector_store %arg6[%c0_22, %c0_23, %c42], %40 {strides = array<i32>} : memref<2x32x128xf32, #tpu.memory_space<vmem>>, vector<2x32x21xf32>,
    %c0_24 = arith.constant 0 : index
    %c0_25 = arith.constant 0 : index
    %c63 = arith.constant 63 : index
    %71 = vector.load %arg6[%c0_24, %c0_25, %c63] : memref<2x32x128xf32, #tpu.memory_space<vmem>>, vector<2x32x20xf32>
    tpu.vector_store %arg6[%c0_24, %c0_25, %c63], %63 {strides = array<i32>} : memref<2x32x128xf32, #tpu.memory_space<vmem>>, vector<2x32x20xf32>,
    %c0_26 = arith.constant 0 : index
    %c0_27 = arith.constant 0 : index
    %c83 = arith.constant 83 : index
    %72 = vector.load %arg6[%c0_26, %c0_27, %c83] : memref<2x32x128xf32, #tpu.memory_space<vmem>>, vector<2x32x21xf32>
    tpu.vector_store %arg6[%c0_26, %c0_27, %c83], %67 {strides = array<i32>} : memref<2x32x128xf32, #tpu.memory_space<vmem>>, vector<2x32x21xf32>,
    %cst_28 = arith.constant 0.000000e+00 : f32
    %73 = vector.broadcast %cst_28 : f32 to vector<2x32x24xf32>
    %c0_29 = arith.constant 0 : index
    %c0_30 = arith.constant 0 : index
    %c104 = arith.constant 104 : index
    %74 = vector.load %arg6[%c0_29, %c0_30, %c104] : memref<2x32x128xf32, #tpu.memory_space<vmem>>, vector<2x32x24xf32>
    tpu.vector_store %arg6[%c0_29, %c0_30, %c104], %73 {strides = array<i32>} : memref<2x32x128xf32, #tpu.memory_space<vmem>>, vector<2x32x24xf32>,
    %cst_31 = arith.constant dense<0.000000e+00> : vector<2x20xf32>
    %75 = vector.multi_reduction <add>, %63, %cst_31 [1] : vector<2x32x20xf32> to vector<2x20xf32>
    %c0_32 = arith.constant 0 : index
    %c0_33 = arith.constant 0 : index
    %76 = vector.load %arg3[%c0_32, %c0_33] : memref<2x20xf32, #tpu.memory_space<vmem>>, vector<2x20xf32>
    %cst_34 = arith.constant 9.99999997E-7 : f32
    %77 = vector.broadcast %cst_34 : f32 to vector<2x20xf32>
    %78 = arith.addf %75, %77 : vector<2x20xf32>
    %79 = math.log %78 : vector<2x20xf32>
    %80 = arith.mulf %76, %79 : vector<2x20xf32>
    %cst_35 = arith.constant 1.000000e+00 : f32
    %81 = vector.broadcast %cst_35 : f32 to vector<2x20xf32>
    %82 = arith.subf %81, %76 : vector<2x20xf32>
    %cst_36 = arith.constant 1.000000e+00 : f32
    %83 = vector.broadcast %cst_36 : f32 to vector<2x20xf32>
    %84 = arith.subf %83, %75 : vector<2x20xf32>
    %cst_37 = arith.constant 9.99999997E-7 : f32
    %85 = vector.broadcast %cst_37 : f32 to vector<2x20xf32>
    %86 = arith.addf %84, %85 : vector<2x20xf32>
    %87 = math.log %86 : vector<2x20xf32>
    %88 = arith.mulf %82, %87 : vector<2x20xf32>
    %89 = arith.addf %80, %88 : vector<2x20xf32>
    %90 = vector.shape_cast %89 : vector<2x20xf32> to vector<1x2x20xf32>
    %cst_38 = arith.constant dense<0.000000e+00> : vector<1xf32>
    %91 = vector.multi_reduction <add>, %90, %cst_38 [1, 2] : vector<1x2x20xf32> to vector<1xf32>
    %92 = vector.shape_cast %91 : vector<1xf32> to vector<1x1x1xf32>
    %93 = vector.extract %92[0, 0, 0] : f32 from vector<1x1x1xf32>
    %cst_39 = arith.constant 0.000000e+00 : f32
    %94 = arith.subf %cst_39, %93 : f32
    %cst_40 = arith.constant 5.000000e-01 : f32
    %95 = arith.mulf %94, %cst_40 : f32
    %c0_41 = arith.constant 0 : index
    %96 = memref.load %arg7[%c0_41] : memref<4xf32, #tpu.memory_space<smem>>
    memref.store %95, %arg7[%c0_41] : memref<4xf32, #tpu.memory_space<smem>>
    %c0_42 = arith.constant 0 : index
    %c0_43 = arith.constant 0 : index
    %c0_44 = arith.constant 0 : index
    %c0_45 = arith.constant 0 : index
    %97 = vector.load %arg4[%c0_42, %c0_43, %c0_44, %c0_45] : memref<3x2x32x21xf32, #tpu.memory_space<vmem>>, vector<1x2x32x21xf32>
    %98 = vector.shape_cast %97 : vector<1x2x32x21xf32> to vector<2x32x21xf32>
    %c0_46 = arith.constant 0 : index
    %c0_47 = arith.constant 0 : index
    %c0_48 = arith.constant 0 : index
    %99 = vector.load %arg5[%c0_46, %c0_47, %c0_48] : memref<3x2x32xf32, #tpu.memory_space<vmem>>, vector<1x2x32xf32>
    %100 = vector.shape_cast %99 : vector<1x2x32xf32> to vector<2x32xf32>
    %cst_49 = arith.constant 9.99999997E-7 : f32
    %101 = vector.broadcast %cst_49 : f32 to vector<2x32x21xf32>
    %102 = arith.addf %18, %101 : vector<2x32x21xf32>
    %103 = math.log %102 : vector<2x32x21xf32>
    %104 = arith.mulf %98, %103 : vector<2x32x21xf32>
    %cst_50 = arith.constant dense<0.000000e+00> : vector<2x32xf32>
    %105 = vector.multi_reduction <add>, %104, %cst_50 [2] : vector<2x32x21xf32> to vector<2x32xf32>
    %cst_51 = arith.constant 0.000000e+00 : f32
    %106 = vector.broadcast %cst_51 : f32 to vector<2x32xf32>
    %107 = arith.subf %106, %100 : vector<2x32xf32>
    %108 = arith.mulf %107, %105 : vector<2x32xf32>
    %109 = vector.shape_cast %108 : vector<2x32xf32> to vector<1x2x32xf32>
    %cst_52 = arith.constant dense<0.000000e+00> : vector<1xf32>
    %110 = vector.multi_reduction <add>, %109, %cst_52 [1, 2] : vector<1x2x32xf32> to vector<1xf32>
    %111 = vector.shape_cast %110 : vector<1xf32> to vector<1x1x1xf32>
    %112 = vector.extract %111[0, 0, 0] : f32 from vector<1x1x1xf32>
    %cst_53 = arith.constant 1.562500e-02 : f32
    %113 = arith.mulf %112, %cst_53 : f32
    %c1 = arith.constant 1 : index
    %114 = memref.load %arg7[%c1] : memref<4xf32, #tpu.memory_space<smem>>
    memref.store %113, %arg7[%c1] : memref<4xf32, #tpu.memory_space<smem>>
    %c1_54 = arith.constant 1 : index
    %c0_55 = arith.constant 0 : index
    %c0_56 = arith.constant 0 : index
    %c0_57 = arith.constant 0 : index
    %115 = vector.load %arg4[%c1_54, %c0_55, %c0_56, %c0_57] : memref<3x2x32x21xf32, #tpu.memory_space<vmem>>, vector<1x2x32x21xf32>
    %116 = vector.shape_cast %115 : vector<1x2x32x21xf32> to vector<2x32x21xf32>
    %c1_58 = arith.constant 1 : index
    %c0_59 = arith.constant 0 : index
    %c0_60 = arith.constant 0 : index
    %117 = vector.load %arg5[%c1_58, %c0_59, %c0_60] : memref<3x2x32xf32, #tpu.memory_space<vmem>>, vector<1x2x32xf32>
    %118 = vector.shape_cast %117 : vector<1x2x32xf32> to vector<2x32xf32>
    %cst_61 = arith.constant 9.99999997E-7 : f32
    %119 = vector.broadcast %cst_61 : f32 to vector<2x32x21xf32>
    %120 = arith.addf %29, %119 : vector<2x32x21xf32>
    %121 = math.log %120 : vector<2x32x21xf32>
    %122 = arith.mulf %116, %121 : vector<2x32x21xf32>
    %cst_62 = arith.constant dense<0.000000e+00> : vector<2x32xf32>
    %123 = vector.multi_reduction <add>, %122, %cst_62 [2] : vector<2x32x21xf32> to vector<2x32xf32>
    %cst_63 = arith.constant 0.000000e+00 : f32
    %124 = vector.broadcast %cst_63 : f32 to vector<2x32xf32>
    %125 = arith.subf %124, %118 : vector<2x32xf32>
    %126 = arith.mulf %125, %123 : vector<2x32xf32>
    %127 = vector.shape_cast %126 : vector<2x32xf32> to vector<1x2x32xf32>
    %cst_64 = arith.constant dense<0.000000e+00> : vector<1xf32>
    %128 = vector.multi_reduction <add>, %127, %cst_64 [1, 2] : vector<1x2x32xf32> to vector<1xf32>
    %129 = vector.shape_cast %128 : vector<1xf32> to vector<1x1x1xf32>
    %130 = vector.extract %129[0, 0, 0] : f32 from vector<1x1x1xf32>
    %cst_65 = arith.constant 1.562500e-02 : f32
    %131 = arith.mulf %130, %cst_65 : f32
    %c2 = arith.constant 2 : index
    %132 = memref.load %arg7[%c2] : memref<4xf32, #tpu.memory_space<smem>>
    memref.store %131, %arg7[%c2] : memref<4xf32, #tpu.memory_space<smem>>
    %c2_66 = arith.constant 2 : index
    %c0_67 = arith.constant 0 : index
    %c0_68 = arith.constant 0 : index
    %c0_69 = arith.constant 0 : index
    %133 = vector.load %arg4[%c2_66, %c0_67, %c0_68, %c0_69] : memref<3x2x32x21xf32, #tpu.memory_space<vmem>>, vector<1x2x32x21xf32>
    %134 = vector.shape_cast %133 : vector<1x2x32x21xf32> to vector<2x32x21xf32>
    %c2_70 = arith.constant 2 : index
    %c0_71 = arith.constant 0 : index
    %c0_72 = arith.constant 0 : index
    %135 = vector.load %arg5[%c2_70, %c0_71, %c0_72] : memref<3x2x32xf32, #tpu.memory_space<vmem>>, vector<1x2x32xf32>
    %136 = vector.shape_cast %135 : vector<1x2x32xf32> to vector<2x32xf32>
    %cst_73 = arith.constant 9.99999997E-7 : f32
    %137 = vector.broadcast %cst_73 : f32 to vector<2x32x21xf32>
    %138 = arith.addf %40, %137 : vector<2x32x21xf32>
    %139 = math.log %138 : vector<2x32x21xf32>
    %140 = arith.mulf %134, %139 : vector<2x32x21xf32>
    %cst_74 = arith.constant dense<0.000000e+00> : vector<2x32xf32>
    %141 = vector.multi_reduction <add>, %140, %cst_74 [2] : vector<2x32x21xf32> to vector<2x32xf32>
    %cst_75 = arith.constant 0.000000e+00 : f32
    %142 = vector.broadcast %cst_75 : f32 to vector<2x32xf32>
    %143 = arith.subf %142, %136 : vector<2x32xf32>
    %144 = arith.mulf %143, %141 : vector<2x32xf32>
    %145 = vector.shape_cast %144 : vector<2x32xf32> to vector<1x2x32xf32>
    %cst_76 = arith.constant dense<0.000000e+00> : vector<1xf32>
    %146 = vector.multi_reduction <add>, %145, %cst_76 [1, 2] : vector<1x2x32xf32> to vector<1xf32>
    %147 = vector.shape_cast %146 : vector<1xf32> to vector<1x1x1xf32>
    %148 = vector.extract %147[0, 0, 0] : f32 from vector<1x1x1xf32>
    %cst_77 = arith.constant 1.562500e-02 : f32
    %149 = arith.mulf %148, %cst_77 : f32
    %c3 = arith.constant 3 : index
    %150 = memref.load %arg7[%c3] : memref<4xf32, #tpu.memory_space<smem>>
    memref.store %149, %arg7[%c3] : memref<4xf32, #tpu.memory_space<smem>>
    return
  }
}

</mosaic_0001>

<bundles_post_ra>
// kernel: tpu_custom_call.1
= control target key start
LH: loop header
LB: loop body
LE: loop exit
PB: predicated region body
PF: predicated region fallthrough
CT: control target
= control target key end

     0   :  { %13 = vsyncpa [#allocation3], 0  ;;  %s2645_s0 = inlined_call_operand.vmem [shape: f32[2,32,128], index: 0, kind: input, shape index: {}]   ;;  %s2646_s1 = inlined_call_operand.vmem [shape: f32[128,128], index: 1, kind: input, shape index: {}]   ;;  %s2647_s2 = inlined_call_operand.vmem [shape: f32[1,128], index: 2, kind: input, shape index: {}]   ;;  %s2648_s3 = inlined_call_operand.vmem [shape: f32[2,20], index: 3, kind: input, shape index: {}]   ;;  %s2649_s4 = inlined_call_operand.vmem [shape: f32[3,2,32,21], index: 4, kind: input, shape index: {}]   ;;  %s2650_s5 = inlined_call_operand.vmem [shape: f32[3,2,32], index: 5, kind: input, shape index: {}]   ;;  %s2651_s6 = inlined_call_operand.hbm [shape: f32[2,32,128], index: 6, kind: output, shape index: {0}]   ;;  %s2652_s7 = inlined_call_operand.hbm [shape: f32[4], index: 7, kind: output, shape index: {1}]  }
   0x1   :  { %v50_v0 = vld [vmem:[%s2646_s1 + $0x78] sm:$0xff]  ;;  %v49_v1 = vld [vmem:[%s2646_s1 + $0x70] sm:$0xff]  ;;  %v48_v2 = vld [vmem:[%s2646_s1 + $0x68] sm:$0xff] }
   0x2   :  { %55 = vmatpush.msra.mxu0 %v50_v0  ;;  %1359 = vmatpush.msra.mxu1 %v50_v0  ;;  %v47_v3 = vld [vmem:[%s2646_s1 + $0x60] sm:$0xff]  ;;  %v46_v4 = vld [vmem:[%s2646_s1 + $0x58] sm:$0xff] }
   0x3   :  { %1360 = vmatpush.msra.mxu2 %v50_v0  ;;  %1361 = vmatpush.msra.mxu3 %v50_v0 }
   0x4   :  { %56 = vmatpush.msra.mxu0 %v49_v1  ;;  %1362 = vmatpush.msra.mxu1 %v49_v1 }
   0x5   :  { %1363 = vmatpush.msra.mxu2 %v49_v1  ;;  %1364 = vmatpush.msra.mxu3 %v49_v1 }
   0x6   :  { %57 = vmatpush.msra.mxu0 %v48_v2  ;;  %1365 = vmatpush.msra.mxu1 %v48_v2 }
   0x7   :  { %1366 = vmatpush.msra.mxu2 %v48_v2  ;;  %1367 = vmatpush.msra.mxu3 %v48_v2 }
   0x8   :  { %58 = vmatpush.msra.mxu0 %v47_v3  ;;  %1368 = vmatpush.msra.mxu1 %v47_v3 }
   0x9   :  { %14 = vsyncpa [#allocation4], 0  ;;  %1369 = vmatpush.msra.mxu2 %v47_v3  ;;  %1370 = vmatpush.msra.mxu3 %v47_v3  ;;  %v45_v5 = vld [vmem:[%s2646_s1 + $0x50] sm:$0xff]  ;;  %v44_v6 = vld [vmem:[%s2646_s1 + $0x48] sm:$0xff]  ;;  %vm96_vm0 = vcmask 171008   ;;  %vm306_vm1 = vcmask 515408  }
   0xa   :  { %59 = vmatpush.msra.mxu0 %v46_v4  ;;  %1371 = vmatpush.msra.mxu1 %v46_v4  ;;  %v43_v7 = vld [vmem:[%s2646_s1 + $0x40] sm:$0xff]  ;;  %v42_v8 = vld [vmem:[%s2646_s1 + $0x38] sm:$0xff]  ;;  %v41_v9 = vld [vmem:[%s2646_s1 + $0x30] sm:$0xff]  ;;  %vm427_vm2 = vcmask 679416   ;;  %vm514_vm3 = vcmask 843416   ;;  %vm185_vm4 = vcmask 343208  }
   0xb   :  { %1372 = vmatpush.msra.mxu2 %v46_v4  ;;  %1373 = vmatpush.msra.mxu3 %v46_v4  ;;  %v40_v10 = vld [vmem:[%s2646_s1 + $0x28] sm:$0xff]  ;;  %v39_v11 = vld [vmem:[%s2646_s1 + $0x20] sm:$0xff]  ;;  %v38_v12 = vld [vmem:[%s2646_s1 + $0x18] sm:$0xff]  ;;  %s1673_s27 = smov 45   ;;  %vm595_vm5 = vcmask 162816   ;;  %vm998_vm6 = vcmask 130112  }
   0xc   :  { %60 = vmatpush.msra.mxu0 %v45_v5  ;;  %1374 = vmatpush.msra.mxu1 %v45_v5  ;;  %v37_v13 = vld [vmem:[%s2646_s1 + $0x10] sm:$0xff]  ;;  %v36_v14 = vld [vmem:[%s2646_s1 + $0x8] sm:$0xff]  ;;  %v35_v15 = vld [vmem:[%s2646_s1] sm:$0xff]  ;;  %s1674_s1 = smov 108   ;;  %vm1002_vm7 = vcmask 195712   ;;  %s1675_s19 = smov 83  }
   0xd   :  { %1375 = vmatpush.msra.mxu2 %v45_v5  ;;  %1376 = vmatpush.msra.mxu3 %v45_v5  ;;  %v27_v16 = vld [vmem:[%s2645_s0] sm:$0xff]  ;;  %v29_v17 = vld [vmem:[%s2645_s0 + $0x10] sm:$0xff]  ;;  %v28_v20 = vld [vmem:[%s2645_s0 + $0x8] sm:$0xff]  ;;  %vm881_vm8 = vcmask 1041409   ;;  %vm828_vm9 = vcmask 851608   ;;  %vm837_vm10 = vcmask 1048384  }
   0xe   :  { %61 = vmatpush.msra.mxu0 %v44_v6  ;;  %1377 = vmatpush.msra.mxu1 %v44_v6  ;;  %v31_v18 = vld [vmem:[%s2645_s0 + $0x20] sm:$0xff]  ;;  %v33_v19 = vld [vmem:[%s2645_s0 + $0x30] sm:$0xff]  ;;  %v30_v21 = vld [vmem:[%s2645_s0 + $0x18] sm:$0xff]  ;;  %vm1006_vm11 = vcmask 261312   ;;  %vm1018_vm12 = vcmask 254976   ;;  %vm904_vm13 = vcmask 156672  }
   0xf   :  { %1378 = vmatpush.msra.mxu2 %v44_v6  ;;  %1379 = vmatpush.msra.mxu3 %v44_v6  ;;  %v32_v22 = vld [vmem:[%s2645_s0 + $0x28] sm:$0xff]  ;;  %v34_v23 = vld [vmem:[%s2645_s0 + $0x38] sm:$0xff]  ;;  %v1426_v24 = vld [vmem:[%s2647_s2] ss:$0 sm:$0xff]  ;;  %s1671_s0 = smov 107   ;;  %s1672_s2 = smov 86  }
  0x10   :  { %62 = vmatpush.msra.mxu0 %v43_v7  ;;  %1380 = vmatpush.msra.mxu1 %v43_v7  ;;  %s1314_s13 = sshll.u32 %s2651_s6, 4  ;;  %s1679_s14 = smov 128   ;;  %s1315_s13 = int_to_ptr.hbm [resolvable:$true] %s1314_s13 }
  0x11   :  { %1381 = vmatpush.msra.mxu2 %v43_v7  ;;  %1382 = vmatpush.msra.mxu3 %v43_v7  ;;  %s1680_s15 = smov 8   ;;  %s1326_s24 = sshll.u32 %s2652_s7, 4  ;;  %s1327_s24 = int_to_ptr.hbm [resolvable:$true] %s1326_s24 }
  0x12   :  { %63 = vmatpush.msra.mxu0 %v42_v8  ;;  %1383 = vmatpush.msra.mxu1 %v42_v8 }
  0x13   :  { %1384 = vmatpush.msra.mxu2 %v42_v8  ;;  %1385 = vmatpush.msra.mxu3 %v42_v8 }
  0x14   :  { %64 = vmatpush.msra.mxu0 %v41_v9  ;;  %1386 = vmatpush.msra.mxu1 %v41_v9 }
  0x15   :  { %1387 = vmatpush.msra.mxu2 %v41_v9  ;;  %1388 = vmatpush.msra.mxu3 %v41_v9 }
  0x16   :  { %65 = vmatpush.msra.mxu0 %v40_v10  ;;  %1389 = vmatpush.msra.mxu1 %v40_v10 }
  0x17   :  { %1390 = vmatpush.msra.mxu2 %v40_v10  ;;  %1391 = vmatpush.msra.mxu3 %v40_v10 }
  0x18   :  { %66 = vmatpush.msra.mxu0 %v39_v11  ;;  %1392 = vmatpush.msra.mxu1 %v39_v11 }
  0x19   :  { %1393 = vmatpush.msra.mxu2 %v39_v11  ;;  %1394 = vmatpush.msra.mxu3 %v39_v11 }
  0x1a   :  { %67 = vmatpush.msra.mxu0 %v38_v12  ;;  %1395 = vmatpush.msra.mxu1 %v38_v12 }
  0x1b   :  { %1396 = vmatpush.msra.mxu2 %v38_v12  ;;  %1397 = vmatpush.msra.mxu3 %v38_v12 }
  0x1c   :  { %68 = vmatpush.msra.mxu0 %v37_v13  ;;  %1398 = vmatpush.msra.mxu1 %v37_v13 }
  0x1d   :  { %1399 = vmatpush.msra.mxu2 %v37_v13  ;;  %1400 = vmatpush.msra.mxu3 %v37_v13 }
  0x1e   :  { %69 = vmatpush.msra.mxu0 %v36_v14  ;;  %1401 = vmatpush.msra.mxu1 %v36_v14 }
  0x1f   :  { %1402 = vmatpush.msra.mxu2 %v36_v14  ;;  %1403 = vmatpush.msra.mxu3 %v36_v14 }
  0x20   :  { %70 = vmatpush.msra.mxu0 %v35_v15  ;;  %1404 = vmatpush.msra.mxu1 %v35_v15 }
  0x21   :  { %1405 = vmatpush.msra.mxu2 %v35_v15  ;;  %1406 = vmatpush.msra.mxu3 %v35_v15 }
  0x22   :  { %71 = vmatmul.f32.vlgmr.msra.gmra.mxu0 %v27_v16  ;;  %77 = vmatmul.f32.vlgmr.msra.gmra.mxu1 %v29_v17 }
  0x23   :  { %83 = vmatmul.f32.vlgmr.msra.gmra.mxu2 %v31_v18  ;;  %89 = vmatmul.f32.vlgmr.msra.gmra.mxu3 %v33_v19 }
  0x2a   :  { %74 = vmatmul.f32.gmra.mxu0 %v28_v20  ;;  %80 = vmatmul.f32.gmra.mxu1 %v30_v21 }
  0x2b   :  { %86 = vmatmul.f32.gmra.mxu2 %v32_v22  ;;  %92 = vmatmul.f32.gmra.mxu3 %v34_v23 }
  0x9f   :  { %v72_v25 = vpop.f32.mrf.mxu0  ;;  %v78_v26 = vpop.f32.mrf.mxu1 }
  0xa0   :  { %v1797_v27 = vadd.f32 %v1426_v24, %v72_v25  ;;  %v1799_v28 = vadd.f32 %v1426_v24, %v78_v26 }
  0xa2   :  { %v103_v29 = vsel %vm96_vm0, %v1799_v28, -inf  ;;  %v307_v30 = vsel %vm306_vm1, %v1797_v27, -inf  ;;  %v97_v31 = vsel %vm96_vm0, %v1797_v27, -inf  ;;  %v192_v38 = vsel %vm185_vm4, %v1799_v28, -inf }
  0xa3   :  { %104 = vmax.xlane.f32.xlu1 %v103_v29  ;;  %308 = vmax.xlane.f32.xlu2 %v307_v30  ;;  %v428_v41 = vsel %vm427_vm2, %v1797_v27, -inf  ;;  %v430_v42 = vsel %vm427_vm2, %v1799_v28, -inf  ;;  %v515_v43 = vsel %vm514_vm3, %v1797_v27, -inf  ;;  %v186_v44 = vsel %vm185_vm4, %v1797_v27, -inf }
  0xa4   :  { %98 = vmax.xlane.f32.xlu0 %v97_v31  ;;  %v431_v47 = vmax.f32 %v428_v41, %v430_v42  ;;  %v313_v0 = vsel %vm306_vm1, %v1799_v28, -inf  ;;  %v521_v11 = vsel %vm514_vm3, %v1799_v28, -inf }
  0xa6   :  { %v84_v32 = vpop.f32.mrf.mxu2  ;;  %v90_v33 = vpop.f32.mrf.mxu3 }
  0xa7   :  { %v75_v34 = vpop.f32.mrf.mxu0  ;;  %v81_v35 = vpop.f32.mrf.mxu1  ;;  %v1813_v39 = vadd.f32 %v1426_v24, %v84_v32  ;;  %v1815_v40 = vadd.f32 %v1426_v24, %v90_v33 }
  0xa8   :  { %v1807_v36 = vadd.f32 %v1426_v24, %v75_v34  ;;  %v1809_v37 = vadd.f32 %v1426_v24, %v81_v35 }
  0xa9   :  { %v441_v49 = vsel %vm427_vm2, %v1813_v39, -inf  ;;  %v443_v50 = vsel %vm427_vm2, %v1815_v40, -inf  ;;  %v109_v56 = vsel %vm96_vm0, %v1813_v39, -inf  ;;  %v204_v57 = vsel %vm185_vm4, %v1815_v40, -inf }
  0xaa   :  { %v429_v45 = vsel %vm427_vm2, %v1807_v36, -inf  ;;  %v432_v46 = vsel %vm427_vm2, %v1809_v37, -inf  ;;  %v444_v59 = vmax.f32 %v441_v49, %v443_v50  ;;  %v198_v5 = vsel %vm185_vm4, %v1813_v39, -inf }
  0xab   :  { %516 = vmax.xlane.f32.xlu2 %v515_v43  ;;  %187 = vmax.xlane.f32.xlu1 %v186_v44  ;;  %v433_v48 = vmax.f32 %v429_v45, %v432_v46  ;;  %v319_v6 = vsel %vm306_vm1, %v1813_v39, -inf  ;;  %v325_v22 = vsel %vm306_vm1, %v1815_v40, -inf  ;;  %v527_v23 = vsel %vm514_vm3, %v1813_v39, -inf }
  0xac   :  { %193 = vmax.xlane.f32.xlu0 %v192_v38  ;;  %v189_v44 = vsel %vm185_vm4, %v1807_v36, -inf  ;;  %v533_v45 = vsel %vm514_vm3, %v1815_v40, -inf }
  0xad   :  { %v434_v53 = vmax.f32 %v431_v47, %v433_v48  ;;  %v100_v48 = vsel %vm96_vm0, %v1807_v36, -inf }
  0xae   :  { %v87_v51 = vpop.f32.mrf.mxu2  ;;  %v93_v52 = vpop.f32.mrf.mxu3 }
  0xaf   :  { %v1833_v54 = vadd.f32 %v1426_v24, %v87_v51  ;;  %v1835_v55 = vadd.f32 %v1426_v24, %v93_v52  ;;  %v435_v58 = vrot.slane %v434_v53, 4  ;;  %v115_v24 = vsel %vm96_vm0, %v1815_v40, -inf }
  0xb1   :  { %v442_v60 = vsel %vm427_vm2, %v1833_v54, -inf  ;;  %v445_v61 = vsel %vm427_vm2, %v1835_v55, -inf  ;;  %v436_v62 = vmax.f32 %v434_v53, %v435_v58 }
  0xb2   :  { %v446_v63 = vmax.f32 %v442_v60, %v445_v61 }
  0xb3   :  { %110 = vmax.xlane.f32.xlu2 %v109_v56  ;;  %205 = vmax.xlane.f32.xlu1 %v204_v57  ;;  %v437_v1 = vrot.slane %v436_v62, 2 }
  0xb4   :  { %314 = vmax.xlane.f32.xlu0 %v313_v0  ;;  %v447_v2 = vmax.f32 %v444_v59, %v446_v63  ;;  %v316_v63 = vsel %vm306_vm1, %v1809_v37, -inf  ;;  %v106_v0 = vsel %vm96_vm0, %v1809_v37, -inf }
  0xb5   :  { %v438_v3 = vmax.f32 %v436_v62, %v437_v1 }
  0xb6   :  { %v448_v4 = vrot.slane %v447_v2, 4 }
  0xb7   :  { %v439_v7 = vrot.slane %v438_v3, 1 }
  0xb8   :  { %v449_v8 = vmax.f32 %v447_v2, %v448_v4 }
  0xb9   :  { %v440_v9 = vmax.f32 %v438_v3, %v439_v7  ;;  %v518_v3 = vsel %vm514_vm3, %v1807_v36, -inf }
  0xba   :  { %v450_v10 = vrot.slane %v449_v8, 2 }
  0xbb   :  { %199 = vmax.xlane.f32.xlu2 %v198_v5  ;;  %320 = vmax.xlane.f32.xlu1 %v319_v6  ;;  %v454_v12 = vsub.f32 %v1797_v27, %v440_v9  ;;  %v455_v13 = vsub.f32 %v1807_v36, %v440_v9  ;;  %v456_v14 = vsub.f32 %v1799_v28, %v440_v9 }
  0xbc   :  { %522 = vmax.xlane.f32.xlu0 %v521_v11  ;;  %v457_v15 = vsub.f32 %v1809_v37, %v440_v9  ;;  %v451_v16 = vmax.f32 %v449_v8, %v450_v10 }
  0xbd   :  { %v462_v17 = vmul.f32 1.442695, %v454_v12  ;;  %v464_v18 = vmul.f32 1.442695, %v455_v13  ;;  %v466_v19 = vmul.f32 1.442695, %v456_v14 }
  0xbe   :  { %v468_v20 = vmul.f32 1.442695, %v457_v15  ;;  %v452_v21 = vrot.slane %v451_v16, 1  ;;  %v524_v12 = vsel %vm514_vm3, %v1809_v37, -inf  ;;  %v195_v13 = vsel %vm185_vm4, %v1809_v37, -inf }
  0xbf   :  { %1427 = vpow2.f32 %v462_v17  ;;  %v201_v15 = vsel %vm185_vm4, %v1833_v54, -inf }
  0xc0   :  { %1429 = vpow2.f32 %v464_v18  ;;  %v453_v25 = vmax.f32 %v451_v16, %v452_v21  ;;  %v310_v21 = vsel %vm306_vm1, %v1807_v36, -inf }
  0xc1   :  { %1431 = vpow2.f32 %v466_v19 }
  0xc2   :  { %1433 = vpow2.f32 %v468_v20  ;;  %v458_v26 = vsub.f32 %v1813_v39, %v453_v25  ;;  %v459_v29 = vsub.f32 %v1833_v54, %v453_v25  ;;  %v460_v30 = vsub.f32 %v1815_v40, %v453_v25 }
  0xc3   :  { %326 = vmax.xlane.f32.xlu2 %v325_v22  ;;  %528 = vmax.xlane.f32.xlu1 %v527_v23  ;;  %v461_v31 = vsub.f32 %v1835_v55, %v453_v25  ;;  %v112_v20 = vsel %vm96_vm0, %v1833_v54, -inf }
  0xc4   :  { %116 = vmax.xlane.f32.xlu0 %v115_v24  ;;  %v470_v32 = vmul.f32 1.442695, %v458_v26  ;;  %v472_v34 = vmul.f32 1.442695, %v459_v29  ;;  %v474_v35 = vmul.f32 1.442695, %v460_v30 }
  0xc5   :  { %v1867_v33 = vpop.eup %1427  ;;  %v476_v38 = vmul.f32 1.442695, %v461_v31  ;;  %v322_v24 = vsel %vm306_vm1, %v1833_v54, -inf  ;;  %v207_v29 = vsel %vm185_vm4, %v1835_v55, -inf  ;;  %v118_v30 = vsel %vm96_vm0, %v1835_v55, -inf }
  0xc6   :  { %v1869_v41 = vpop.eup %1429  ;;  %v478_v42 = vsel %vm427_vm2, %v1867_v33, 0.0  ;;  %1435 = vpow2.f32 %v470_v32  ;;  %v536_v31 = vsel %vm514_vm3, %v1835_v55, -inf }
  0xc7   :  { %v1873_v43 = vpop.eup %1431  ;;  %v479_v46 = vsel %vm427_vm2, %v1869_v41, 0.0  ;;  %1437 = vpow2.f32 %v472_v34  ;;  %v530_v34 = vsel %vm514_vm3, %v1833_v54, -inf }
  0xc8   :  { %v1434_v47 = vpop.eup %1433  ;;  %v480_v49 = vadd.f32 %v479_v46, %v478_v42  ;;  %1439 = vpow2.f32 %v474_v35  ;;  %v481_v50 = vsel %vm427_vm2, %v1873_v43, 0.0  ;;  %v328_v35 = vsel %vm306_vm1, %v1835_v55, -inf }
  0xc9   :  { %1441 = vpow2.f32 %v476_v38  ;;  %v483_v52 = vsel %vm427_vm2, %v1434_v47, 0.0 }
  0xca   :  { %v482_v51 = vadd.f32 %v481_v50, %v480_v49 }
  0xcb   :  { %190 = vmax.xlane.f32.xlu2 %v189_v44  ;;  %534 = vmax.xlane.f32.xlu1 %v533_v45 }
  0xcc   :  { %101 = vmax.xlane.f32.xlu0 %v100_v48  ;;  %v1886_v53 = vpop.eup %1435  ;;  %v484_v56 = vadd.f32 %v483_v52, %v482_v51 }
  0xcd   :  { %v1438_v57 = vpop.eup %1437  ;;  %v491_v58 = vsel %vm427_vm2, %v1886_v53, 0.0 }
  0xce   :  { %v1890_v59 = vpop.eup %1439  ;;  %v485_v60 = vrot.slane %v484_v56, 4  ;;  %v492_v61 = vsel %vm427_vm2, %v1438_v57, 0.0 }
  0xcf   :  { %v1893_v62 = vpop.eup %1441  ;;  %v493_v1 = vadd.f32 %v492_v61, %v491_v58  ;;  %v494_v2 = vsel %vm427_vm2, %v1890_v59, 0.0 }
  0xd0   :  { %v486_v4 = vadd.f32 %v485_v60, %v484_v56  ;;  %v496_v5 = vsel %vm427_vm2, %v1893_v62, 0.0 }
  0xd1   :  { %v495_v6 = vadd.f32 %v494_v2, %v493_v1 }
  0xd2   :  { %v487_v7 = vrot.slane %v486_v4, 2 }
  0xd3   :  { %317 = vmax.xlane.f32.xlu2 %v316_v63  ;;  %107 = vmax.xlane.f32.xlu1 %v106_v0  ;;  %v497_v8 = vadd.f32 %v496_v5, %v495_v6 }
  0xd4   :  { %519 = vmax.xlane.f32.xlu0 %v518_v3  ;;  %v488_v9 = vadd.f32 %v487_v7, %v486_v4 }
  0xd5   :  { %v498_v10 = vrot.slane %v497_v8, 4 }
  0xd6   :  { %v489_v11 = vrot.slane %v488_v9, 1 }
  0xd7   :  { %v499_v14 = vadd.f32 %v498_v10, %v497_v8 }
  0xd8   :  { %v490_v16 = vadd.f32 %v489_v11, %v488_v9 }
  0xd9   :  { %v500_v17 = vrot.slane %v499_v14, 2 }
  0xda   :  { %1443 = vrcp.f32 %v490_v16 }
  0xdb   :  { %525 = vmax.xlane.f32.xlu2 %v524_v12  ;;  %196 = vmax.xlane.f32.xlu1 %v195_v13  ;;  %v501_v18 = vadd.f32 %v500_v17, %v499_v14 }
  0xdc   :  { %202 = vmax.xlane.f32.xlu0 %v201_v15 }
  0xdd   :  { %v502_v19 = vrot.slane %v501_v18, 1 }
  0xdf   :  { %v503_v22 = vadd.f32 %v502_v19, %v501_v18 }
  0xe0   :  { %v1915_v23 = vpop.eup %1443 }
  0xe1   :  { %1445 = vrcp.f32 %v503_v22  ;;  %v1920_v25 = vmul.f32 %v1915_v23, %v1434_v47 }
  0xe3   :  { %113 = vmax.xlane.f32.xlu2 %v112_v20  ;;  %311 = vmax.xlane.f32.xlu1 %v310_v21 }
  0xe4   :  { %323 = vmax.xlane.f32.xlu0 %v322_v24 }
  0xe7   :  { %v1922_v26 = vpop.eup %1445 }
  0xe8   :  { %v1931_v32 = vmul.f32 %v1922_v26, %v1438_v57 }
  0xeb   :  { %208 = vmax.xlane.f32.xlu2 %v207_v29  ;;  %119 = vmax.xlane.f32.xlu1 %v118_v30 }
  0xec   :  { %537 = vmax.xlane.f32.xlu0 %v536_v31 }
  0xf3   :  { %531 = vmax.xlane.f32.xlu2 %v530_v34  ;;  %329 = vmax.xlane.f32.xlu1 %v328_v35 }
 0x116   :  { %v105_v38 = vpop.xlane.xlu1 %104  ;;  %v309_v45 = vpop.xlane.xlu2 %308 }
 0x117   :  { %v99_v42 = vpop.xlane.xlu0 %98  ;;  %v331_v51 = vsub.f32 %v1797_v27, %v309_v45  ;;  %v123_v22 = vsub.f32 %v1799_v28, %v105_v38 }
 0x118   :  { %v121_v17 = vsub.f32 %v1797_v27, %v99_v42 }
 0x119   :  { %v339_v57 = vmul.f32 1.442695, %v331_v51 }
 0x11a   :  { %v129_v18 = vmul.f32 1.442695, %v121_v17 }
 0x11e   :  { %v188_v44 = vpop.xlane.xlu1 %187  ;;  %v517_v60 = vpop.xlane.xlu2 %516 }
 0x11f   :  { %v210_v46 = vsub.f32 %v1797_v27, %v188_v44  ;;  %v194_v47 = vpop.xlane.xlu0 %193  ;;  %v539_v1 = vsub.f32 %v1797_v27, %v517_v60  ;;  %v133_v27 = vmul.f32 1.442695, %v123_v22 }
 0x120   :  { %v212_v48 = vsub.f32 %v1799_v28, %v194_v47 }
 0x121   :  { %v218_v49 = vmul.f32 1.442695, %v210_v46  ;;  %v547_v3 = vmul.f32 1.442695, %v539_v1 }
 0x122   :  { %v222_v50 = vmul.f32 1.442695, %v212_v48 }
 0x123   :  { %1447 = vpow2.f32 %v218_v49 }
 0x124   :  { %1449 = vpow2.f32 %v222_v50 }
 0x125   :  { %1451 = vpow2.f32 %v339_v57 }
 0x126   :  { %v206_v52 = vpop.xlane.xlu1 %205  ;;  %v111_v21 = vpop.xlane.xlu2 %110 }
 0x127   :  { %v315_v56 = vpop.xlane.xlu0 %314  ;;  %v216_v9 = vsub.f32 %v1815_v40, %v206_v52  ;;  %v125_v35 = vsub.f32 %v1813_v39, %v111_v21 }
 0x128   :  { %v333_v58 = vsub.f32 %v1799_v28, %v315_v56 }
 0x129   :  { %v1941_v61 = vpop.eup %1447  ;;  %v230_v10 = vmul.f32 1.442695, %v216_v9  ;;  %v137_v45 = vmul.f32 1.442695, %v125_v35 }
 0x12a   :  { %v343_v63 = vmul.f32 1.442695, %v333_v58  ;;  %v1943_v0 = vpop.eup %1449  ;;  %242 = vrot.lane.b32.xlu0 %v1941_v61, %s1671_s0 }
 0x12b   :  { %246 = vrot.lane.b32.xlu2 %v1943_v0, %s1671_s0  ;;  %v1951_v6 = vpop.eup %1451 }
 0x12c   :  { %1453 = vpow2.f32 %v343_v63 }
 0x12d   :  { %1455 = vpow2.f32 %v547_v3 }
 0x12e   :  { %v321_v4 = vpop.xlane.xlu1 %320  ;;  %v200_v29 = vpop.xlane.xlu2 %199 }
 0x12f   :  { %v523_v2 = vpop.xlane.xlu0 %522  ;;  %v214_v30 = vsub.f32 %v1813_v39, %v200_v29 }
 0x130   :  { %v541_v5 = vsub.f32 %v1799_v28, %v523_v2  ;;  %v335_v28 = vsub.f32 %v1813_v39, %v321_v4 }
 0x131   :  { %v226_v34 = vmul.f32 1.442695, %v214_v30 }
 0x132   :  { %v551_v7 = vmul.f32 1.442695, %v541_v5  ;;  %v1953_v8 = vpop.eup %1453  ;;  %363 = vrot.lane.b32.xlu0 %v1951_v6, %s1672_s2  ;;  %v347_v46 = vmul.f32 1.442695, %v335_v28 }
 0x133   :  { %367 = vrot.lane.b32.xlu1 %v1953_v8, %s1672_s2  ;;  %v1960_v11 = vpop.eup %1455 }
 0x134   :  { %1457 = vpow2.f32 %v551_v7 }
 0x135   :  { %1459 = vpow2.f32 %v230_v10 }
 0x136   :  { %v529_v12 = vpop.xlane.xlu1 %528  ;;  %v327_v38 = vpop.xlane.xlu2 %326 }
 0x137   :  { %v543_v14 = vsub.f32 %v1813_v39, %v529_v12  ;;  %v117_v49 = vpop.xlane.xlu0 %116  ;;  %v337_v50 = vsub.f32 %v1815_v40, %v327_v38 }
 0x138   :  { %v127_v22 = vsub.f32 %v1815_v40, %v117_v49 }
 0x139   :  { %v555_v15 = vmul.f32 1.442695, %v543_v14  ;;  %v351_v56 = vmul.f32 1.442695, %v337_v50 }
 0x13a   :  { %v1962_v13 = vpop.eup %1457  ;;  %v141_v30 = vmul.f32 1.442695, %v127_v22 }
 0x13b   :  { %571 = vrot.lane.b32.xlu1 %v1960_v11, %s1673_s27  ;;  %575 = vrot.lane.b32.xlu0 %v1962_v13, %s1673_s27  ;;  %v1969_v16 = vpop.eup %1459  ;;  %1461 = vpow2.f32 %v555_v15 }
 0x13c   :  { %1463 = vpow2.f32 %v129_v18 }
 0x13d   :  { %1465 = vpow2.f32 %v133_v27 }
 0x13e   :  { %v535_v42 = vpop.xlane.xlu1 %534  ;;  %1467 = vpow2.f32 %v226_v34  ;;  %v191_v51 = vpop.xlane.xlu2 %190 }
 0x13f   :  { %1469 = vpow2.f32 %v137_v45  ;;  %v545_v58 = vsub.f32 %v1815_v40, %v535_v42  ;;  %v102_v63 = vpop.xlane.xlu0 %101  ;;  %v211_v7 = vsub.f32 %v1807_v36, %v191_v51 }
 0x140   :  { %1471 = vpow2.f32 %v347_v46  ;;  %v122_v51 = vsub.f32 %v1807_v36, %v102_v63 }
 0x141   :  { %v1974_v19 = vpop.eup %1461  ;;  %1473 = vpow2.f32 %v351_v56  ;;  %v559_v3 = vmul.f32 1.442695, %v545_v58  ;;  %v220_v12 = vmul.f32 1.442695, %v211_v7 }
 0x142   :  { %v1978_v20 = vpop.eup %1463 }
 0x143   :  { %254 = vrot.lane.b32.xlu0 %v1969_v16, %s1671_s0  ;;  %v145_v24 = vsel %vm96_vm0, %v1978_v20, 0.0  ;;  %v1984_v31 = vpop.eup %1465  ;;  %1475 = vpow2.f32 %v559_v3 }
 0x144   :  { %v151_v44 = vsel %vm96_vm0, %v1984_v31, 0.0  ;;  %v1990_v47 = vpop.eup %1467 }
 0x145   :  { %v1997_v52 = vpop.eup %1469 }
 0x146   :  { %v1994_v48 = vpop.xlane.xlu1 %107  ;;  %v1999_v39 = vpop.eup %1471  ;;  %v157_v57 = vsel %vm96_vm0, %v1997_v52, 0.0 }
 0x147   :  { %v318_v1 = vpop.xlane.xlu2 %317  ;;  %v2007_v4 = vpop.eup %1473 }
 0x148   :  { %v334_v9 = vsub.f32 %v1809_v37, %v318_v1  ;;  %v520_v10 = vpop.xlane.xlu0 %519 }
 0x149   :  { %v2013_v15 = vpop.eup %1475 }
 0x14a   :  { %v345_v17 = vmul.f32 1.442695, %v334_v9 }
 0x14b   :  { %579 = vrot.lane.b32.xlu0 %v1974_v19, %s1673_s27 }
 0x14e   :  { %v197_v60 = vpop.xlane.xlu1 %196 }
 0x14f   :  { %v213_v2 = vsub.f32 %v1809_v37, %v197_v60  ;;  %v526_v14 = vpop.xlane.xlu2 %525  ;;  %v540_v60 = vsub.f32 %v1807_v36, %v520_v10 }
 0x150   :  { %v542_v18 = vsub.f32 %v1809_v37, %v526_v14  ;;  %v203_v27 = vpop.xlane.xlu0 %202 }
 0x151   :  { %v224_v5 = vmul.f32 1.442695, %v213_v2  ;;  %v215_v34 = vsub.f32 %v1833_v54, %v203_v27  ;;  %v549_v2 = vmul.f32 1.442695, %v540_v60 }
 0x153   :  { %1477 = vpow2.f32 %v224_v5  ;;  %v228_v42 = vmul.f32 1.442695, %v215_v34 }
 0x154   :  { %146 = vadd.xlane.f32.xlu2 %v145_v24  ;;  %1479 = vpow2.f32 %v220_v12  ;;  %v553_v24 = vmul.f32 1.442695, %v542_v18 }
 0x155   :  { %1481 = vpow2.f32 %v345_v17 }
 0x156   :  { %1483 = vpow2.f32 %v553_v24  ;;  %v312_v46 = vpop.xlane.xlu1 %311 }
 0x157   :  { %1485 = vpow2.f32 %v141_v30  ;;  %v114_v45 = vpop.xlane.xlu2 %113  ;;  %v332_v50 = vsub.f32 %v1807_v36, %v312_v46 }
 0x158   :  { %1487 = vpow2.f32 %v228_v42  ;;  %v324_v49 = vpop.xlane.xlu0 %323  ;;  %v126_v63 = vsub.f32 %v1833_v54, %v114_v45 }
 0x159   :  { %v2018_v21 = vpop.eup %1477  ;;  %v341_v56 = vmul.f32 1.442695, %v332_v50  ;;  %v336_v18 = vsub.f32 %v1833_v54, %v324_v49 }
 0x15a   :  { %v2023_v29 = vpop.eup %1479  ;;  %v139_v36 = vmul.f32 1.442695, %v126_v63 }
 0x15b   :  { %v2028_v35 = vpop.eup %1481  ;;  %1489 = vpow2.f32 %v341_v56  ;;  %v349_v27 = vmul.f32 1.442695, %v336_v18 }
 0x15e   :  { %v2051_v5 = vpop.xlane.xlu1 %119 }
 0x15f   :  { %v2046_v58 = vpop.xlane.xlu2 %208 }
 0x160   :  { %v538_v1 = vpop.xlane.xlu0 %537 }
 0x161   :  { %v546_v45 = vsub.f32 %v1835_v55, %v538_v1 }
 0x163   :  { %v561_v49 = vmul.f32 1.442695, %v546_v45 }
 0x165   :  { %152 = vadd.xlane.f32.xlu1 %v151_v44  ;;  %v2032_v44 = vpop.eup %1483 }
 0x166   :  { %v2036_v40 = vpop.eup %1485  ;;  %v330_v17 = vpop.xlane.xlu1 %329 }
 0x167   :  { %v163_v28 = vsel %vm96_vm0, %v2036_v40, 0.0  ;;  %v2040_v38 = vpop.eup %1487  ;;  %v2058_v12 = vpop.xlane.xlu2 %531 }
 0x168   :  { %v2049_v3 = vpop.eup %1489 }
 0x16c   :  { %250 = vrot.lane.b32.xlu2 %v1990_v47, %s1671_s0 }
 0x174   :  { %371 = vrot.lane.b32.xlu2 %v1999_v39, %s1672_s2 }
 0x175   :  { %158 = vadd.xlane.f32.xlu0 %v157_v57  ;;  %v131_v57 = vmul.f32 1.442695, %v122_v51 }
 0x177   :  { %1491 = vpow2.f32 %v131_v57 }
 0x178   :  { %1493 = vpow2.f32 %v549_v2  ;;  %v124_v2 = vsub.f32 %v1809_v37, %v1994_v48 }
 0x179   :  { %1495 = vpow2.f32 %v139_v36 }
 0x17a   :  { %1497 = vpow2.f32 %v349_v27  ;;  %v135_v36 = vmul.f32 1.442695, %v124_v2  ;;  %v128_v2 = vsub.f32 %v1835_v55, %v2051_v5 }
 0x17d   :  { %v2056_v9 = vpop.eup %1491 }
 0x17e   :  { %375 = vrot.lane.b32.xlu1 %v2007_v4, %s1672_s2  ;;  %v148_v10 = vsel %vm96_vm0, %v2056_v9, 0.0  ;;  %v2062_v14 = vpop.eup %1493 }
 0x17f   :  { %v2071_v30 = vpop.eup %1495 }
 0x180   :  { %v2080_v50 = vpop.eup %1497 }
 0x185   :  { %v2067_v22 = vpop.permute.xlu2 %246 }
 0x186   :  { %583 = vrot.lane.b32.xlu1 %v2013_v15, %s1673_s27 }
 0x189   :  { %248 = vrot.lane.b32.xlu0 %v2018_v21, %s1671_s0 }
 0x18e   :  { %244 = vrot.lane.b32.xlu1 %v2023_v29, %s1671_s0 }
 0x191   :  { %369 = vrot.lane.b32.xlu0 %v2028_v35, %s1672_s2 }
 0x196   :  { %577 = vrot.lane.b32.xlu1 %v2032_v44, %s1673_s27 }
 0x19c   :  { %v243_v7 = vpop.permute.xlu0 %242 }
 0x19d   :  { %164 = vadd.xlane.f32.xlu2 %v163_v28  ;;  %v160_v28 = vsel %vm96_vm0, %v2071_v30, 0.0  ;;  %v266_v57 = vsel %vm96_vm0, %v243_v7, 0.0 }
 0x19e   :  { %252 = vrot.lane.b32.xlu1 %v2040_v38, %s1671_s0 }
 0x1a4   :  { %v2069_v24 = vpop.permute.xlu0 %363 }
 0x1a5   :  { %v2073_v34 = vpop.permute.xlu1 %367 }
 0x1ad   :  { %v2078_v46 = vpop.permute.xlu0 %575  ;;  %v2088_v60 = vpop.permute.xlu1 %571 }
 0x1b5   :  { %365 = vrot.lane.b32.xlu2 %v2049_v3, %s1672_s2  ;;  %v255_v63 = vpop.permute.xlu0 %254 }
 0x1b6   :  { %v284_v7 = vsel %vm96_vm0, %v255_v63, 0.0 }
 0x1bb   :  { %149 = vadd.xlane.f32.xlu0 %v148_v10 }
 0x1bd   :  { %573 = vrot.lane.b32.xlu2 %v2062_v14, %s1673_s27 }
 0x1c7   :  { %v147_v42 = vpop.xlane.xlu2 %146 }
 0x1c8   :  { %1499 = vrcp.f32 %v147_v42  ;;  %161 = vadd.xlane.f32.xlu1 %v160_v28  ;;  %v580_v28 = vpop.permute.xlu0 %579 }
 0x1c9   :  { %1501 = vpow2.f32 %v561_v49  ;;  %v608_v49 = vsel %vm595_vm5, %v580_v28, 0.0 }
 0x1ce   :  { %v1500_v51 = vpop.eup %1499 }
 0x1cf   :  { %v2083_v56 = vmul.f32 %v1500_v51, %v1978_v20  ;;  %373 = vrot.lane.b32.xlu0 %v2080_v50, %s1672_s2  ;;  %v2092_v1 = vpop.permute.xlu2 %250  ;;  %v2096_v20 = vpop.eup %1501 }
 0x1d0   :  { %267 = vadd.xlane.f32.xlu1 %v266_v57 }
 0x1d1   :  { %764 = vst.msk [vmem:[#allocation2] sm:$0xff] %vm96_vm0, %v2083_v56 }
 0x1d7   :  { %585 = vrot.lane.b32.xlu0 %v2096_v20, %s1673_s27  ;;  %v372_v18 = vpop.permute.xlu2 %371 }
 0x1d8   :  { %v153_v10 = vpop.xlane.xlu1 %152  ;;  %285 = vadd.xlane.f32.xlu1 %v284_v7  ;;  %v399_v42 = vsel %vm96_vm0, %v372_v18, 0.0 }
 0x1d9   :  { %1503 = vrcp.f32 %v153_v10  ;;  %v338_v10 = vsub.f32 %v1835_v55, %v330_v17 }
 0x1da   :  { %1505 = vpow2.f32 %v135_v36  ;;  %v143_v36 = vmul.f32 1.442695, %v128_v2 }
 0x1db   :  { %v353_v18 = vmul.f32 1.442695, %v338_v10 }
 0x1df   :  { %v1504_v27 = vpop.eup %1503 }
 0x1e0   :  { %v2103_v37 = vmul.f32 %v1504_v27, %v1984_v31  ;;  %400 = vadd.xlane.f32.xlu1 %v399_v42  ;;  %v2105_v48 = vpop.eup %1505  ;;  %v217_v31 = vsub.f32 %v1835_v55, %v2046_v58 }
 0x1e1   :  { %v154_v45 = vsel %vm96_vm0, %v2105_v48, 0.0 }
 0x1e2   :  { %766 = vst.msk [vmem:[#allocation2 + $0x10] sm:$0xff] %vm96_vm0, %v2103_v37  ;;  %v232_v7 = vmul.f32 1.442695, %v217_v31 }
 0x1e6   :  { %155 = vadd.xlane.f32.xlu2 %v154_v45  ;;  %v387_v45 = vsel %vm96_vm0, %v2069_v24, 0.0  ;;  %v278_v24 = vsel %vm96_vm0, %v2092_v1, 0.0 }
 0x1e8   :  { %609 = vadd.xlane.f32.xlu1 %v608_v49  ;;  %v159_v51 = vpop.xlane.xlu0 %158 }
 0x1e9   :  { %1507 = vrcp.f32 %v159_v51 }
 0x1ea   :  { %1509 = vpow2.f32 %v232_v7 }
 0x1eb   :  { %1511 = vpow2.f32 %v143_v36 }
 0x1ec   :  { %1513 = vpow2.f32 %v353_v18 }
 0x1ef   :  { %v1508_v57 = vpop.eup %1507 }
 0x1f0   :  { %v2117_v63 = vmul.f32 %v1508_v57, %v1997_v52  ;;  %v2122_v42 = vpop.eup %1509  ;;  %v544_v52 = vsub.f32 %v1833_v54, %v2058_v12  ;;  %v376_v49 = vpop.permute.xlu1 %375  ;;  %v602_v12 = vsel %vm595_vm5, %v2078_v46, 0.0 }
 0x1f1   :  { %v2125_v28 = vpop.eup %1511  ;;  %v405_v18 = vsel %vm96_vm0, %v376_v49, 0.0  ;;  %v272_v49 = vsel %vm96_vm0, %v2067_v22, 0.0 }
 0x1f2   :  { %768 = vst.msk [vmem:[#allocation2 + $0x20] sm:$0xff] %vm96_vm0, %v2117_v63  ;;  %v166_v5 = vsel %vm96_vm0, %v2125_v28, 0.0  ;;  %v557_v55 = vmul.f32 1.442695, %v544_v52  ;;  %v2133_v17 = vpop.eup %1513 }
 0x1f4   :  { %1515 = vpow2.f32 %v557_v55 }
 0x1f8   :  { %v584_v31 = vpop.permute.xlu1 %583 }
 0x1fa   :  { %v2139_v51 = vpop.eup %1515 }
 0x1fb   :  { %v249_v27 = vpop.permute.xlu0 %248 }
 0x1fc   :  { %v275_v58 = vsel %vm96_vm0, %v249_v27, 0.0 }
 0x1fd   :  { %276 = vadd.xlane.f32.xlu1 %v275_v58 }
 0x1fe   :  { %256 = vrot.lane.b32.xlu2 %v2122_v42, %s1671_s0 }
 0x200   :  { %v245_v10 = vpop.permute.xlu1 %244 }
 0x201   :  { %167 = vadd.xlane.f32.xlu0 %v166_v5  ;;  %v269_v58 = vsel %vm96_vm0, %v245_v10, 0.0 }
 0x206   :  { %377 = vrot.lane.b32.xlu2 %v2133_v17, %s1672_s2 }
 0x208   :  { %v578_v52 = vpop.permute.xlu1 %577 }
 0x209   :  { %388 = vadd.xlane.f32.xlu0 %v387_v45 }
 0x20e   :  { %581 = vrot.lane.b32.xlu2 %v2139_v51, %s1673_s27 }
 0x210   :  { %v165_v54 = vpop.xlane.xlu2 %164  ;;  %v253_v55 = vpop.permute.xlu1 %252 }
 0x211   :  { %1517 = vrcp.f32 %v165_v54  ;;  %603 = vadd.xlane.f32.xlu0 %v602_v12 }
 0x217   :  { %v1518_v57 = vpop.eup %1517 }
 0x218   :  { %v2146_v2 = vmul.f32 %v1518_v57, %v2036_v40  ;;  %v366_v7 = vpop.permute.xlu2 %365  ;;  %v370_v40 = vpop.permute.xlu0 %369  ;;  %v393_v57 = vsel %vm96_vm0, %v2073_v34, 0.0 }
 0x219   :  { %279 = vadd.xlane.f32.xlu0 %v278_v24  ;;  %v390_v36 = vsel %vm96_vm0, %v366_v7, 0.0  ;;  %v396_v5 = vsel %vm96_vm0, %v370_v40, 0.0 }
 0x21a   :  { %770 = vst.msk [vmem:[#allocation2 + $0x30] sm:$0xff] %vm96_vm0, %v2146_v2  ;;  %391 = vadd.xlane.f32.xlu1 %v390_v36 }
 0x220   :  { %v574_v46 = vpop.permute.xlu2 %573 }
 0x221   :  { %406 = vadd.xlane.f32.xlu0 %v405_v18  ;;  %v599_v27 = vsel %vm595_vm5, %v574_v46, 0.0 }
 0x222   :  { %600 = vadd.xlane.f32.xlu1 %v599_v27 }
 0x229   :  { %270 = vadd.xlane.f32.xlu0 %v269_v58 }
 0x22e   :  { %v150_v1 = vpop.xlane.xlu0 %149 }
 0x22f   :  { %1519 = vrcp.f32 %v150_v1 }
 0x231   :  { %397 = vadd.xlane.f32.xlu0 %v396_v5 }
 0x235   :  { %v1520_v45 = vpop.eup %1519 }
 0x236   :  { %v2158_v54 = vmul.f32 %v1520_v45, %v2056_v9  ;;  %v596_v9 = vsel %vm595_vm5, %v2088_v60, 0.0  ;;  %v605_v60 = vsel %vm595_vm5, %v578_v52, 0.0 }
 0x237   :  { %273 = vadd.xlane.f32.xlu2 %v272_v49 }
 0x238   :  { %765 = vst.msk [vmem:[#allocation2 + $0x8] sm:$0xff] %vm96_vm0, %v2158_v54 }
 0x23b   :  { %v162_v12 = vpop.xlane.xlu1 %161 }
 0x23c   :  { %1521 = vrcp.f32 %v162_v12  ;;  %v932_v12 = vadd.f32 1e-06, %v2117_v63 }
 0x23f   :  { %394 = vadd.xlane.f32.xlu2 %v393_v57 }
 0x241   :  { %v374_v45 = vpop.permute.xlu0 %373 }
 0x242   :  { %v1522_v7 = vpop.eup %1521  ;;  %v402_v57 = vsel %vm96_vm0, %v374_v45, 0.0 }
 0x243   :  { %v2167_v24 = vmul.f32 %v1522_v7, %v2071_v30  ;;  %v268_v36 = vpop.xlane.xlu1 %267  ;;  %v614_v30 = vsel %vm595_vm5, %v584_v31, 0.0  ;;  %v281_v31 = vsel %vm96_vm0, %v253_v55, 0.0  ;;  %v934_v55 = vadd.f32 1e-06, %v2146_v2 }
 0x244   :  { %1523 = vrcp.f32 %v268_v36 }
 0x245   :  { %769 = vst.msk [vmem:[#allocation2 + $0x28] sm:$0xff] %vm96_vm0, %v2167_v24 }
 0x247   :  { %597 = vadd.xlane.f32.xlu2 %v596_v9 }
 0x24a   :  { %v1524_v22 = vpop.eup %1523 }
 0x24b   :  { %v286_v10 = vpop.xlane.xlu1 %285  ;;  %v2174_v46 = vmul.f32 %v1524_v22, %v1941_v61  ;;  %v928_v61 = vadd.f32 1e-06, %v2083_v56  ;;  %v933_v22 = vadd.f32 1e-06, %v2167_v24 }
 0x24c   :  { %1525 = vrcp.f32 %v286_v10 }
 0x24d   :  { %772 = vst.msk [vmem:[#allocation2] sm:$0xff] %vm185_vm4, %v2174_v46 }
 0x24f   :  { %615 = vadd.xlane.f32.xlu2 %v614_v30 }
 0x252   :  { %v1526_v34 = vpop.eup %1525 }
 0x253   :  { %v2180_v18 = vmul.f32 %v1526_v34, %v1969_v16  ;;  %v2186_v40 = vpop.xlane.xlu1 %400  ;;  %v930_v16 = vadd.f32 1e-06, %v2103_v37 }
 0x255   :  { %778 = vst.msk [vmem:[#allocation2 + $0x30] sm:$0xff] %vm185_vm4, %v2180_v18 }
 0x257   :  { %606 = vadd.xlane.f32.xlu2 %v605_v60  ;;  %v586_v60 = vpop.permute.xlu0 %585 }
 0x259   :  { %v156_v27 = vpop.xlane.xlu2 %155 }
 0x25a   :  { %1527 = vrcp.f32 %v156_v27  ;;  %v929_v27 = vadd.f32 1e-06, %v2158_v54 }
 0x25b   :  { %1529 = vlog2.f32 %v928_v61  ;;  %v2202_v36 = vpop.xlane.xlu1 %609 }
 0x25c   :  { %1531 = vlog2.f32 %v930_v16  ;;  %v921_v16 = vld [vmem:[%s2649_s4 + $0x10] sm:$0xff] }
 0x25d   :  { %1533 = vlog2.f32 %v932_v12 }
 0x25e   :  { %1535 = vlog2.f32 %v934_v55  ;;  %v617_v55 = vsel %vm595_vm5, %v586_v60, 0.0 }
 0x25f   :  { %282 = vadd.xlane.f32.xlu2 %v281_v31  ;;  %1537 = vlog2.f32 %v933_v22  ;;  %v923_v22 = vld [vmem:[%s2649_s4 + $0x20] sm:$0xff] }
 0x260   :  { %v1528_v58 = vpop.eup %1527  ;;  %1539 = vlog2.f32 %v929_v27 }
 0x261   :  { %v2191_v1 = vmul.f32 %v1528_v58, %v2105_v48  ;;  %v257_v5 = vpop.permute.xlu2 %256  ;;  %v1530_v49 = vpop.eup %1529  ;;  %v919_v48 = vld [vmem:[%s2649_s4] sm:$0xff] }
 0x262   :  { %v287_v52 = vsel %vm96_vm0, %v257_v5, 0.0  ;;  %v937_v7 = vmul.f32 0.6931472, %v1530_v49  ;;  %v1532_v10 = vpop.eup %1531 }
 0x263   :  { %767 = vst.msk [vmem:[#allocation2 + $0x18] sm:$0xff] %vm96_vm0, %v2191_v1  ;;  %288 = vadd.xlane.f32.xlu0 %v287_v52  ;;  %v941_v61 = vmul.f32 0.6931472, %v1532_v10  ;;  %v1534_v31 = vpop.eup %1533 }
 0x264   :  { %v952_v34 = vmul.f32 %v937_v7, %v919_v48  ;;  %v1536_v5 = vpop.eup %1535  ;;  %v945_v7 = vmul.f32 0.6931472, %v1534_v31 }
 0x265   :  { %v954_v49 = vmul.f32 %v941_v61, %v921_v16  ;;  %v1538_v48 = vpop.eup %1537 }
 0x266   :  { %v960_v58 = vsel %vm96_vm0, %v952_v34, 0.0  ;;  %v956_v60 = vmul.f32 %v945_v7, %v923_v22  ;;  %v947_v61 = vmul.f32 0.6931472, %v1538_v48 }
 0x267   :  { %403 = vadd.xlane.f32.xlu2 %v402_v57  ;;  %v949_v57 = vmul.f32 0.6931472, %v1536_v5  ;;  %v966_v34 = vsel %vm96_vm0, %v954_v49, 0.0 }
 0x269   :  { %v378_v9 = vpop.permute.xlu2 %377 }
 0x26a   :  { %v408_v30 = vsel %vm96_vm0, %v378_v9, 0.0  ;;  %v925_v9 = vld [vmem:[%s2649_s4 + $0x30] sm:$0xff] }
 0x26b   :  { %409 = vadd.xlane.f32.xlu1 %v408_v30  ;;  %v1540_v30 = vpop.eup %1539  ;;  %v958_v27 = vmul.f32 %v949_v57, %v925_v9 }
 0x26d   :  { %v978_v5 = vsel %vm96_vm0, %v958_v27, 0.0 }
 0x26f   :  { %961 = vadd.xlane.f32.xlu2 %v960_v58  ;;  %v924_v58 = vld [vmem:[%s2649_s4 + $0x28] sm:$0xff] }
 0x270   :  { %v277_v45 = vpop.xlane.xlu1 %276 }
 0x271   :  { %1541 = vrcp.f32 %v277_v45  ;;  %v582_v52 = vpop.permute.xlu2 %581  ;;  %v972_v45 = vsel %vm96_vm0, %v956_v60, 0.0 }
 0x272   :  { %v611_v12 = vsel %vm595_vm5, %v582_v52, 0.0  ;;  %v957_v52 = vmul.f32 %v947_v61, %v924_v58 }
 0x273   :  { %612 = vadd.xlane.f32.xlu0 %v611_v12  ;;  %618 = vadd.xlane.f32.xlu1 %v617_v55  ;;  %v939_v12 = vmul.f32 0.6931472, %v1540_v30  ;;  %v920_v55 = vld [vmem:[%s2649_s4 + $0x8] sm:$0xff] }
 0x274   :  { %v168_v10 = vpop.xlane.xlu0 %167  ;;  %v975_v7 = vsel %vm96_vm0, %v957_v52, 0.0 }
 0x275   :  { %1543 = vrcp.f32 %v168_v10  ;;  %v953_v48 = vmul.f32 %v939_v12, %v920_v55 }
 0x277   :  { %v1542_v31 = vpop.eup %1541  ;;  %967 = vadd.xlane.f32.xlu2 %v966_v34  ;;  %v963_v9 = vsel %vm96_vm0, %v953_v48, 0.0 }
 0x278   :  { %v2224_v16 = vmul.f32 %v1542_v31, %v2018_v21 }
 0x27a   :  { %775 = vst.msk [vmem:[#allocation2 + $0x18] sm:$0xff] %vm185_vm4, %v2224_v16 }
 0x27b   :  { %v1544_v49 = vpop.eup %1543  ;;  %979 = vadd.xlane.f32.xlu0 %v978_v5  ;;  %973 = vadd.xlane.f32.xlu1 %v972_v45 }
 0x27c   :  { %v2234_v57 = vmul.f32 %v1544_v49, %v2125_v28  ;;  %v389_v21 = vpop.xlane.xlu0 %388 }
 0x27d   :  { %1545 = vrcp.f32 %v389_v21 }
 0x27e   :  { %771 = vst.msk [vmem:[#allocation2 + $0x38] sm:$0xff] %vm96_vm0, %v2234_v57 }
 0x27f   :  { %976 = vadd.xlane.f32.xlu2 %v975_v7 }
 0x283   :  { %v1546_v22 = vpop.eup %1545  ;;  %964 = vadd.xlane.f32.xlu0 %v963_v9 }
 0x284   :  { %v604_v10 = vpop.xlane.xlu0 %603  ;;  %v2241_v30 = vmul.f32 %v1546_v22, %v1951_v6 }
 0x285   :  { %1547 = vrcp.f32 %v604_v10 }
 0x286   :  { %780 = vst.msk [vmem:[#allocation2] sm:$0xff] %vm306_vm1, %v2241_v30  ;;  %1549 = vrcp.f32 %v2186_v40 }
 0x28b   :  { %v1548_v34 = vpop.eup %1547 }
 0x28c   :  { %v280_v28 = vpop.xlane.xlu0 %279  ;;  %v1550_v27 = vpop.eup %1549  ;;  %v630_v60 = vmul.f32 %v1548_v34, %v1962_v13 }
 0x28d   :  { %1551 = vrcp.f32 %v280_v28  ;;  %v2252_v58 = vmul.f32 %v1550_v27, %v1999_v39  ;;  %v392_v40 = vpop.xlane.xlu1 %391 }
 0x293   :  { %v1552_v61 = vpop.eup %1551 }
 0x294   :  { %648 = vrot.lane.b32.xlu1 %v630_v60, %s1674_s1  ;;  %v407_v31 = vpop.xlane.xlu0 %406  ;;  %v2249_v6 = vmul.f32 %v1552_v61, %v1990_v47 }
 0x295   :  { %1553 = vrcp.f32 %v407_v31 }
 0x296   :  { %776 = vst.msk [vmem:[#allocation2 + $0x20] sm:$0xff] %vm185_vm4, %v2249_v6  ;;  %1555 = vrcp.f32 %v392_v40  ;;  %v1181_v40 = vadd.f32 1e-06, %v2241_v30 }
 0x297   :  { %784 = vst.msk [vmem:[#allocation2 + $0x20] sm:$0xff] %vm306_vm1, %v2252_v58 }
 0x29b   :  { %v1554_v13 = vpop.eup %1553 }
 0x29c   :  { %v271_v5 = vpop.xlane.xlu0 %270  ;;  %v2259_v45 = vmul.f32 %v1554_v13, %v2007_v4  ;;  %v1556_v47 = vpop.eup %1555 }
 0x29d   :  { %1557 = vrcp.f32 %v271_v5  ;;  %v2267_v49 = vmul.f32 %v1556_v47, %v2049_v3 }
 0x29e   :  { %786 = vst.msk [vmem:[#allocation2 + $0x30] sm:$0xff] %vm306_vm1, %v2259_v45 }
 0x2a3   :  { %v1558_v39 = vpop.eup %1557 }
 0x2a4   :  { %v398_v52 = vpop.xlane.xlu0 %397  ;;  %v2264_v12 = vmul.f32 %v1558_v39, %v2023_v29 }
 0x2a5   :  { %1559 = vrcp.f32 %v398_v52 }
 0x2a6   :  { %773 = vst.msk [vmem:[#allocation2 + $0x8] sm:$0xff] %vm185_vm4, %v2264_v12 }
 0x2a7   :  { %781 = vst.msk [vmem:[#allocation2 + $0x8] sm:$0xff] %vm306_vm1, %v2267_v49 }
 0x2aa   :  { %v274_v4 = vpop.xlane.xlu2 %273 }
 0x2ab   :  { %v1560_v55 = vpop.eup %1559  ;;  %1561 = vrcp.f32 %v274_v4 }
 0x2ac   :  { %v2274_v21 = vmul.f32 %v1560_v55, %v2028_v35 }
 0x2ae   :  { %783 = vst.msk [vmem:[#allocation2 + $0x18] sm:$0xff] %vm306_vm1, %v2274_v21 }
 0x2b1   :  { %v1562_v29 = vpop.eup %1561 }
 0x2b2   :  { %v395_v7 = vpop.xlane.xlu2 %394  ;;  %v2279_v3 = vmul.f32 %v1562_v29, %v1943_v0 }
 0x2b3   :  { %1563 = vrcp.f32 %v395_v7 }
 0x2b4   :  { %688 = vrot.lane.b32.xlu2 %v2279_v3, %s1671_s0  ;;  %774 = vst.msk [vmem:[#allocation2 + $0x10] sm:$0xff] %vm185_vm4, %v2279_v3  ;;  %1565 = vrcp.f32 %v2202_v36 }
 0x2b9   :  { %v1564_v48 = vpop.eup %1563 }
 0x2ba   :  { %v598_v35 = vpop.xlane.xlu2 %597  ;;  %v421_v9 = vmul.f32 %v1564_v48, %v1953_v8  ;;  %v1566_v0 = vpop.eup %1565 }
 0x2bb   :  { %1567 = vrcp.f32 %v598_v35  ;;  %v632_v34 = vmul.f32 %v1566_v0, %v1974_v19  ;;  %v601_v8 = vpop.xlane.xlu1 %600 }
 0x2bc   :  { %724 = vrot.lane.b32.xlu2 %v2241_v30, %s1672_s2  ;;  %728 = vrot.lane.b32.xlu1 %v421_v9, %s1672_s2  ;;  %782 = vst.msk [vmem:[#allocation2 + $0x10] sm:$0xff] %vm306_vm1, %v421_v9  ;;  %v1183_v39 = vadd.f32 1e-06, %v421_v9 }
 0x2c1   :  { %v1568_v22 = vpop.eup %1567 }
 0x2c2   :  { %v616_v10 = vpop.xlane.xlu2 %615  ;;  %v628_v28 = vmul.f32 %v1568_v22, %v1960_v11 }
 0x2c3   :  { %1569 = vrcp.f32 %v616_v10 }
 0x2c4   :  { %644 = vrot.lane.b32.xlu0 %v628_v28, %s1674_s1  ;;  %652 = vrot.lane.b32.xlu2 %v632_v34, %s1674_s1  ;;  %1571 = vrcp.f32 %v601_v8  ;;  %v1185_v8 = vadd.f32 1e-06, %v2252_v58 }
 0x2c9   :  { %v1570_v36 = vpop.eup %1569 }
 0x2ca   :  { %v607_v27 = vpop.xlane.xlu2 %606  ;;  %v634_v60 = vmul.f32 %v1570_v36, %v2013_v15  ;;  %v1572_v11 = vpop.eup %1571  ;;  %v1043_v15 = vadd.f32 1e-06, %v2174_v46 }
 0x2cb   :  { %v629_v61 = vmul.f32 %v1572_v11, %v2062_v14 }
 0x2cc   :  { %684 = vrot.lane.b32.xlu0 %v2174_v46, %s1671_s0  ;;  %656 = vrot.lane.b32.xlu1 %v634_v60, %s1674_s1 }
 0x2cd   :  { %736 = vrot.lane.b32.xlu2 %v2259_v45, %s1672_s2 }
 0x2d2   :  { %v283_v19 = vpop.xlane.xlu2 %282 }
 0x2d3   :  { %1573 = vrcp.f32 %v283_v19 }
 0x2d4   :  { %696 = vrot.lane.b32.xlu0 %v2180_v18, %s1671_s0  ;;  %692 = vrot.lane.b32.xlu1 %v2249_v6, %s1671_s0 }
 0x2d5   :  { %646 = vrot.lane.b32.xlu2 %v629_v61, %s1674_s1 }
 0x2d6   :  { %v289_v31 = vpop.xlane.xlu0 %288 }
 0x2d7   :  { %1575 = vrcp.f32 %v289_v31 }
 0x2d8   :  { %1577 = vlog2.f32 %v1043_v15 }
 0x2d9   :  { %v1574_v13 = vpop.eup %1573  ;;  %1579 = vrcp.f32 %v607_v27 }
 0x2da   :  { %v404_v5 = vpop.xlane.xlu2 %403  ;;  %1581 = vlog2.f32 %v1181_v40  ;;  %v2310_v14 = vmul.f32 %v1574_v13, %v2040_v38  ;;  %v1049_v13 = vadd.f32 1e-06, %v2180_v18 }
 0x2db   :  { %1583 = vrcp.f32 %v404_v5 }
 0x2dc   :  { %732 = vrot.lane.b32.xlu0 %v2252_v58, %s1672_s2  ;;  %686 = vrot.lane.b32.xlu1 %v2264_v12, %s1671_s0  ;;  %777 = vst.msk [vmem:[#allocation2 + $0x28] sm:$0xff] %vm185_vm4, %v2310_v14 }
 0x2dd   :  { %v1576_v46 = vpop.eup %1575  ;;  %730 = vrot.lane.b32.xlu2 %v2274_v21, %s1672_s2 }
 0x2de   :  { %v1578_v30 = vpop.eup %1577  ;;  %v410_v47 = vpop.xlane.xlu1 %409  ;;  %v2321_v38 = vmul.f32 %v1576_v46, %v2122_v42 }
 0x2df   :  { %v1580_v52 = vpop.eup %1579  ;;  %1585 = vrcp.f32 %v410_v47  ;;  %v1052_v48 = vmul.f32 0.6931472, %v1578_v30  ;;  %v1044_v47 = vadd.f32 1e-06, %v2264_v12  ;;  %v1046_v12 = vadd.f32 1e-06, %v2224_v16 }
 0x2e0   :  { %v1582_v4 = vpop.eup %1581  ;;  %779 = vst.msk [vmem:[#allocation2 + $0x38] sm:$0xff] %vm185_vm4, %v2321_v38  ;;  %v631_v7 = vmul.f32 %v1580_v52, %v2032_v44  ;;  %1587 = vlog2.f32 %v1183_v39 }
 0x2e1   :  { %v1584_v55 = vpop.eup %1583  ;;  %v1190_v0 = vmul.f32 0.6931472, %v1582_v4 }
 0x2e2   :  { %v962_v29 = vpop.xlane.xlu2 %961  ;;  %v424_v35 = vmul.f32 %v1584_v55, %v2080_v50  ;;  %v993_v50 = vlaneseq }
 0x2e4   :  { %650 = vrot.lane.b32.xlu0 %v631_v7, %s1674_s1  ;;  %1075 = vrot.lane.b32.xlu1 %v1052_v48, %s1671_s0  ;;  %785 = vst.msk [vmem:[#allocation2 + $0x28] sm:$0xff] %vm306_vm1, %v424_v35  ;;  %v2341_v36 = vand.u32 127, %v993_v50 }
 0x2e5   :  { %v1586_v42 = vpop.eup %1585  ;;  %1213 = vrot.lane.b32.xlu2 %v1190_v0, %s1672_s2 }
 0x2e6   :  { %v619_v9 = vpop.xlane.xlu1 %618  ;;  %v613_v22 = vpop.xlane.xlu0 %612  ;;  %v2332_v10 = vmul.f32 %v1586_v42, %v2133_v17  ;;  %v1045_v17 = vadd.f32 1e-06, %v2279_v3  ;;  %v2346_v60 = vadd.s32 4294967288, %v2341_v36  ;;  %v2349_v61 = vadd.s32 4294967280, %v2341_v36 }
 0x2e7   :  { %v1588_v44 = vpop.eup %1587  ;;  %1589 = vrcp.f32 %v619_v9  ;;  %v995_v52 = vperm.slane %v962_v29, %v2341_v36  ;;  %v1186_v42 = vadd.f32 1e-06, %v424_v35 }
 0x2e8   :  { %787 = vst.msk [vmem:[#allocation2 + $0x38] sm:$0xff] %vm306_vm1, %v2332_v10  ;;  %v1194_v34 = vmul.f32 0.6931472, %v1588_v44  ;;  %1591 = vlog2.f32 %v1185_v8 }
 0x2e9   :  { %1593 = vlog2.f32 %v1045_v17  ;;  %v1050_v17 = vadd.f32 1e-06, %v2321_v38 }
 0x2ea   :  { %v968_v28 = vpop.xlane.xlu2 %967  ;;  %1595 = vlog2.f32 %v1049_v13 }
 0x2eb   :  { %v1001_v55 = vperm.slane %v968_v28, %v2349_v61  ;;  %1597 = vrcp.f32 %v613_v22 }
 0x2ec   :  { %690 = vrot.lane.b32.xlu0 %v2224_v16, %s1671_s0  ;;  %698 = vrot.lane.b32.xlu1 %v2321_v38, %s1671_s0  ;;  %1599 = vlog2.f32 %v1044_v47  ;;  %v508_v16 = vmul.f32 %v1915_v23, %v1873_v43  ;;  %v1187_v43 = vadd.f32 1e-06, %v2259_v45  ;;  %v1182_v45 = vadd.f32 1e-06, %v2267_v49 }
 0x2ed   :  { %1217 = vrot.lane.b32.xlu2 %v1194_v34, %s1672_s2  ;;  %v1590_v11 = vpop.eup %1589  ;;  %1601 = vlog2.f32 %v1046_v12  ;;  %v1047_v34 = vadd.f32 1e-06, %v2249_v6  ;;  %v931_v12 = vadd.f32 1e-06, %v2191_v1 }
 0x2ee   :  { %v980_v27 = vpop.xlane.xlu0 %979  ;;  %v974_v19 = vpop.xlane.xlu1 %973  ;;  %v635_v40 = vmul.f32 %v1590_v11, %v2096_v20  ;;  %1603 = vlog2.f32 %v1186_v42 }
 0x2ef   :  { %v1008_v58 = vperm.slane %v974_v19, %v2341_v36  ;;  %v1011_v3 = vperm.slane %v980_v27, %v2349_v61  ;;  %v1592_v46 = vpop.eup %1591  ;;  %1605 = vlog2.f32 %v1047_v34  ;;  %v922_v34 = vld [vmem:[%s2649_s4 + $0x18] sm:$0xff] }
 0x2f0   :  { %v1594_v39 = vpop.eup %1593  ;;  %v1198_v48 = vmul.f32 0.6931472, %v1592_v46 }
 0x2f1   :  { %v1056_v7 = vmul.f32 0.6931472, %v1594_v39  ;;  %v1596_v29 = vpop.eup %1595  ;;  %v510_v39 = vmul.f32 %v1922_v26, %v1886_v53  ;;  %v507_v53 = vmul.f32 %v1915_v23, %v1869_v41 }
 0x2f2   :  { %v977_v15 = vpop.xlane.xlu2 %976  ;;  %v1598_v9 = vpop.eup %1597  ;;  %v1064_v44 = vmul.f32 0.6931472, %v1596_v29 }
 0x2f3   :  { %v1009_v31 = vperm.slane %v977_v15, %v2346_v60  ;;  %v1600_v22 = vpop.eup %1599  ;;  %v633_v50 = vmul.f32 %v1598_v9, %v2139_v51 }
 0x2f4   :  { %726 = vrot.lane.b32.xlu0 %v2267_v49, %s1672_s2  ;;  %734 = vrot.lane.b32.xlu1 %v424_v35, %s1672_s2  ;;  %v1054_v28 = vmul.f32 0.6931472, %v1600_v22  ;;  %v1048_v35 = vadd.f32 1e-06, %v2310_v14  ;;  %v1602_v27 = vpop.eup %1601  ;;  %v506_v22 = vmul.f32 %v1915_v23, %v1867_v33 }
 0x2f5   :  { %v1010_v5 = vsel %vm998_vm6, %v1009_v31, %v1008_v58  ;;  %658 = vrot.lane.b32.xlu2 %v635_v40, %s1674_s1  ;;  %v1604_v11 = vpop.eup %1603  ;;  %v1058_v6 = vmul.f32 0.6931472, %v1602_v27 }
 0x2f6   :  { %v965_v30 = vpop.xlane.xlu0 %964  ;;  %v2363_v20 = vsel %vm1002_vm7, %v1011_v3, %v1010_v5  ;;  %1607 = vlog2.f32 %v1048_v35  ;;  %v1200_v19 = vmul.f32 0.6931472, %v1604_v11  ;;  %v1606_v38 = vpop.eup %1605 }
 0x2f7   :  { %v997_v4 = vperm.slane %v965_v30, %v2346_v60  ;;  %1609 = vlog2.f32 %v1050_v17  ;;  %v1060_v3 = vmul.f32 0.6931472, %v1606_v38 }
 0x2f8   :  { %1611 = vlog2.f32 %v1187_v43 }
 0x2f9   :  { %v999_v18 = vsel %vm998_vm6, %v997_v4, %v995_v52  ;;  %v1184_v52 = vadd.f32 1e-06, %v2274_v21 }
 0x2fa   :  { %v2370_v0 = vsel %vm1002_vm7, %v1001_v55, %v999_v18 }
 0x2fc   :  { %1079 = vrot.lane.b32.xlu0 %v1056_v7, %s1671_s0  ;;  %1221 = vrot.lane.b32.xlu1 %v1198_v48, %s1672_s2  ;;  %v1608_v58 = vpop.eup %1607 }
 0x2fd   :  { %694 = vrot.lane.b32.xlu2 %v2310_v14, %s1671_s0  ;;  %v1188_v14 = vadd.f32 1e-06, %v2332_v10  ;;  %v1610_v31 = vpop.eup %1609  ;;  %v1062_v40 = vmul.f32 0.6931472, %v1608_v58 }
 0x2fe   :  { %v1066_v13 = vmul.f32 0.6931472, %v1610_v31  ;;  %v1612_v5 = vpop.eup %1611  ;;  %v935_v31 = vadd.f32 1e-06, %v2234_v57 }
 0x2ff   :  { %1613 = vlog2.f32 %v1188_v14  ;;  %v1202_v47 = vmul.f32 0.6931472, %v1612_v5 }
 0x300   :  { %1615 = vlog2.f32 %v1182_v45 }
 0x301   :  { %1617 = vlog2.f32 %v1184_v52 }
 0x302   :  { %1619 = vlog2.f32 %v931_v12 }
 0x303   :  { %1621 = vlog2.f32 %v935_v31 }
 0x304   :  { %1087 = vrot.lane.b32.xlu1 %v1064_v44, %s1671_s0  ;;  %654 = vrot.lane.b32.xlu0 %v633_v50, %s1674_s1 }
 0x305   :  { %1077 = vrot.lane.b32.xlu2 %v1054_v28, %s1671_s0  ;;  %v1614_v46 = vpop.eup %1613 }
 0x306   :  { %v649_v8 = vpop.permute.xlu1 %648  ;;  %v1204_v30 = vmul.f32 0.6931472, %v1614_v46  ;;  %v1616_v55 = vpop.eup %1615 }
 0x307   :  { %v2386_v51 = vmul.f32 %v649_v8, %v508_v16  ;;  %v1192_v49 = vmul.f32 0.6931472, %v1616_v55  ;;  %v1618_v7 = vpop.eup %1617 }
 0x308   :  { %v1196_v29 = vmul.f32 0.6931472, %v1618_v7  ;;  %v1620_v9 = vpop.eup %1619 }
 0x309   :  { %790 = vst.msk [vmem:[#allocation2 + $0x10] sm:$0xff] %vm427_vm2, %v2386_v51  ;;  %v943_v44 = vmul.f32 0.6931472, %v1620_v9  ;;  %v849_v33 = vsel %vm427_vm2, %v2386_v51, 0.0  ;;  %v1622_v5 = vpop.eup %1621 }
 0x30b   :  { %v955_v17 = vmul.f32 %v943_v44, %v922_v34 }
 0x30c   :  { %1081 = vrot.lane.b32.xlu1 %v1058_v6, %s1671_s0  ;;  %738 = vrot.lane.b32.xlu0 %v2332_v10, %s1672_s2  ;;  %v512_v6 = vmul.f32 %v1922_v26, %v1890_v59 }
 0x30d   :  { %1223 = vrot.lane.b32.xlu2 %v1200_v19, %s1672_s2  ;;  %v969_v11 = vsel %vm96_vm0, %v955_v17, 0.0 }
 0x30e   :  { %v2396_v15 = vpop.permute.xlu2 %688 }
 0x314   :  { %1085 = vrot.lane.b32.xlu1 %v1062_v40, %s1671_s0  ;;  %1083 = vrot.lane.b32.xlu0 %v1060_v3, %s1671_s0 }
 0x315   :  { %1089 = vrot.lane.b32.xlu2 %v1066_v13, %s1671_s0  ;;  %s1681_s0 = smov [#allocation5]  }
 0x316   :  { %v725_v10 = vpop.permute.xlu2 %724 }
 0x31c   :  { %1227 = vrot.lane.b32.xlu1 %v1204_v30, %s1672_s2  ;;  %1225 = vrot.lane.b32.xlu0 %v1202_v47, %s1672_s2  ;;  %v951_v30 = vmul.f32 0.6931472, %v1622_v5 }
 0x31e   :  { %v653_v4 = vpop.permute.xlu2 %652 }
 0x31f   :  { %v2407_v18 = vmul.f32 %v653_v4, %v510_v39  ;;  %v926_v39 = vld [vmem:[%s2649_s4 + $0x38] sm:$0xff] }
 0x321   :  { %792 = vst.msk [vmem:[#allocation2 + $0x20] sm:$0xff] %vm427_vm2, %v2407_v18 }
 0x324   :  { %1215 = vrot.lane.b32.xlu0 %v1192_v49, %s1672_s2 }
 0x327   :  { %v737_v48 = vpop.permute.xlu2 %736 }
 0x32c   :  { %1219 = vrot.lane.b32.xlu0 %v1196_v29, %s1672_s2 }
 0x32e   :  { %v729_v50 = vpop.permute.xlu1 %728 }
 0x32f   :  { %v647_v21 = vpop.permute.xlu2 %646 }
 0x330   :  { %v669_v42 = vmul.f32 %v647_v21, %v507_v53  ;;  %v710_v21 = vadd.f32 %v2396_v15, %v2103_v37 }
 0x332   :  { %789 = vst.msk [vmem:[#allocation2 + $0x8] sm:$0xff] %vm427_vm2, %v669_v42  ;;  %v847_v8 = vsel %vm427_vm2, %v669_v42, 0.0  ;;  %v750_v42 = vadd.f32 %v729_v50, %v710_v21 }
 0x334   :  { %v758_v34 = vmul.f32 0.33333334, %v750_v42 }
 0x336   :  { %v645_v28 = vpop.permute.xlu0 %644 }
 0x337   :  { %v731_v16 = vpop.permute.xlu2 %730  ;;  %v668_v35 = vmul.f32 %v645_v28, %v506_v22 }
 0x339   :  { %v846_v41 = vsel %vm427_vm2, %v668_v35, 0.0  ;;  %788 = vst.msk [vmem:[#allocation2] sm:$0xff] %vm427_vm2, %v668_v35 }
 0x33a   :  { %v848_v27 = vadd.f32 %v847_v8, %v846_v41 }
 0x33c   :  { %v850_v23 = vadd.f32 %v849_v33, %v848_v27 }
 0x33e   :  { %970 = vadd.xlane.f32.xlu2 %v969_v11  ;;  %v657_v19 = vpop.permute.xlu1 %656  ;;  %v685_v43 = vpop.permute.xlu0 %684 }
 0x33f   :  { %v2430_v14 = vmul.f32 %v657_v19, %v512_v6  ;;  %v1214_v38 = vpop.permute.xlu2 %1213  ;;  %v708_v58 = vadd.f32 %v685_v43, %v2083_v56  ;;  %v859_v6 = vsel %vm427_vm2, %v2407_v18, 0.0 }
 0x341   :  { %794 = vst.msk [vmem:[#allocation2 + $0x30] sm:$0xff] %vm427_vm2, %v2430_v14  ;;  %v748_v51 = vadd.f32 %v725_v10, %v708_v58  ;;  %v513_v10 = vmul.f32 %v1922_v26, %v1893_v62  ;;  %v862_v58 = vsel %vm427_vm2, %v2430_v14, 0.0 }
 0x343   :  { %v756_v40 = vmul.f32 0.33333334, %v748_v51 }
 0x345   :  { %804 = vrot.lane.b32.xlu1 %v756_v40, %s1675_s19 }
 0x346   :  { %v697_v59 = vpop.permute.xlu0 %696  ;;  %v693_v56 = vpop.permute.xlu1 %692 }
 0x347   :  { %v2437_v3 = vpop.permute.xlu2 %1217  ;;  %v714_v13 = vadd.f32 %v697_v59, %v2146_v2  ;;  %v712_v46 = vadd.f32 %v693_v56, %v2117_v63  ;;  %v959_v2 = vmul.f32 %v951_v30, %v926_v39 }
 0x349   :  { %v2440_v45 = vadd.f32 %v737_v48, %v714_v13  ;;  %v981_v49 = vsel %vm96_vm0, %v959_v2, 0.0 }
 0x34e   :  { %v733_v47 = vpop.permute.xlu0 %732  ;;  %v687_v26 = vpop.permute.xlu1 %686 }
 0x34f   :  { %v659_v52 = vpop.permute.xlu2 %658  ;;  %v2448_v4 = vadd.f32 %v733_v47, %v712_v46  ;;  %v709_v22 = vadd.f32 %v687_v26, %v2158_v54  ;;  %v1343_v54 = vld [vmem:[%s2649_s4 + $0x50] sm:$0xff] }
 0x350   :  { %v675_v55 = vmul.f32 %v659_v52, %v513_v10  ;;  %v1356_v26 = vld [vmem:[%s2649_s4 + $0xb0] sm:$0xff] }
 0x352   :  { %795 = vst.msk [vmem:[#allocation2 + $0x38] sm:$0xff] %vm427_vm2, %v675_v55  ;;  %v864_v51 = vsel %vm427_vm2, %v675_v55, 0.0 }
 0x356   :  { %982 = vadd.xlane.f32.xlu0 %v981_v49  ;;  %v651_v63 = vpop.permute.xlu0 %650  ;;  %v1076_v9 = vpop.permute.xlu1 %1075 }
 0x357   :  { %v671_v7 = vmul.f32 %v651_v63, %v1920_v25  ;;  %v1350_v25 = vld [vmem:[%s2649_s4 + $0x80] sm:$0xff]  ;;  %v2486_v39 = vpop.permute.xlu2 %694 }
 0x358   :  { %v1237_v8 = vmul.f32 %v1350_v25, %v1214_v38 }
 0x359   :  { %v851_v62 = vsel %vm427_vm2, %v671_v7, 0.0  ;;  %791 = vst.msk [vmem:[#allocation2 + $0x18] sm:$0xff] %vm427_vm2, %v671_v7 }
 0x35a   :  { %v852_v48 = vadd.f32 %v851_v62, %v850_v23  ;;  %v1245_v15 = vsel %vm96_vm0, %v1237_v8, 0.0  ;;  %v1345_v62 = vld [vmem:[%s2649_s4 + $0x60] sm:$0xff] }
 0x35e   :  { %v691_v12 = vpop.permute.xlu0 %690 }
 0x35f   :  { %v711_v29 = vadd.f32 %v691_v12, %v2191_v1  ;;  %v853_v1 = vrot.slane %v852_v48, 4  ;;  %v1078_v25 = vpop.permute.xlu2 %1077 }
 0x361   :  { %v2456_v53 = vadd.f32 %v731_v16, %v711_v29  ;;  %v699_v16 = vpop.permute.xlu1 %698  ;;  %v854_v50 = vadd.f32 %v853_v1, %v852_v48  ;;  %v1352_v1 = vld [vmem:[%s2649_s4 + $0x90] sm:$0xff] }
 0x363   :  { %v855_v17 = vrot.slane %v854_v50, 2 }
 0x365   :  { %v856_v19 = vadd.f32 %v855_v17, %v854_v50 }
 0x366   :  { %v727_v44 = vpop.permute.xlu0 %726 }
 0x367   :  { %v749_v28 = vadd.f32 %v727_v44, %v709_v22  ;;  %v857_v40 = vrot.slane %v856_v19, 1 }
 0x369   :  { %v757_v35 = vmul.f32 0.33333334, %v749_v28  ;;  %v2472_v11 = vpop.permute.xlu1 %734  ;;  %v858_v56 = vadd.f32 %v857_v40, %v856_v19 }
 0x36a   :  { %808 = vrot.lane.b32.xlu0 %v758_v34, %s1675_s19 }
 0x36b   :  { %806 = vrot.lane.b32.xlu2 %v757_v35, %s1675_s19  ;;  %v888_v47 = vsub.f32 1.0, %v858_v56  ;;  %v873_v55 = vadd.f32 1e-06, %v858_v56  ;;  %v1342_v35 = vld [vmem:[%s2649_s4 + $0x48] sm:$0xff] }
 0x36d   :  { %v890_v49 = vadd.f32 1e-06, %v888_v47  ;;  %1623 = vlog2.f32 %v873_v55  ;;  %v1348_v55 = vld [vmem:[%s2649_s4 + $0x78] sm:$0xff] }
 0x36e   :  { %v1080_v37 = vpop.permute.xlu0 %1079 }
 0x36f   :  { %1246 = vadd.xlane.f32.xlu1 %v1245_v15  ;;  %v1101_v41 = vmul.f32 %v1343_v54, %v1080_v37  ;;  %1625 = vlog2.f32 %v890_v49  ;;  %v1347_v15 = vld [vmem:[%s2649_s4 + $0x70] sm:$0xff]  ;;  %v1100_v54 = vmul.f32 %v1342_v35, %v1078_v25  ;;  %v1676_v35 = vmov 0.0  }
 0x371   :  { %v1113_v33 = vsel %vm96_vm0, %v1101_v41, 0.0  ;;  %v2484_v46 = vpop.permute.xlu1 %1221 }
 0x373   :  { %v1624_v34 = vpop.eup %1623 }
 0x374   :  { %v876_v50 = vmul.f32 0.6931472, %v1624_v34 }
 0x375   :  { %v1626_v8 = vpop.eup %1625 }
 0x376   :  { %v655_v27 = vpop.permute.xlu0 %654  ;;  %v893_v19 = vmul.f32 0.6931472, %v1626_v8 }
 0x377   :  { %v673_v23 = vmul.f32 %v655_v27, %v1931_v32  ;;  %1114 = vadd.xlane.f32.xlu1 %v1113_v33  ;;  %v715_v32 = vadd.f32 %v699_v16, %v2234_v57  ;;  %v1341_v57 = vld [vmem:[%s2649_s4 + $0x40] sm:$0xff]  ;;  %v1239_v27 = vmul.f32 %v1352_v1, %v2437_v3  ;;  %v2552_v1 = vadd.s32 4294967272, %v2341_v36 }
 0x378   :  { %v1099_v42 = vmul.f32 %v1341_v57, %v1076_v9 }
 0x379   :  { %v860_v43 = vsel %vm427_vm2, %v673_v23, 0.0  ;;  %793 = vst.msk [vmem:[#allocation2 + $0x28] sm:$0xff] %vm427_vm2, %v673_v23  ;;  %v1088_v7 = vpop.permute.xlu1 %1087 }
 0x37a   :  { %v861_v38 = vadd.f32 %v860_v43, %v859_v6  ;;  %v1107_v16 = vsel %vm96_vm0, %v1099_v42, 0.0  ;;  %v1105_v23 = vmul.f32 %v1347_v15, %v1088_v7  ;;  %v1346_v42 = vld [vmem:[%s2649_s4 + $0x68] sm:$0xff] }
 0x37c   :  { %v863_v31 = vadd.f32 %v862_v58, %v861_v38  ;;  %v1110_v38 = vsel %vm96_vm0, %v1100_v54, 0.0  ;;  %v1125_v3 = vsel %vm96_vm0, %v1105_v23, 0.0  ;;  %v759_v54 = vmul.f32 0.33333334, %v2456_v53 }
 0x37e   :  { %v865_v59 = vadd.f32 %v864_v51, %v863_v31  ;;  %v739_v13 = vpop.permute.xlu0 %738  ;;  %v1224_v31 = vpop.permute.xlu2 %1223  ;;  %v1344_v51 = vld [vmem:[%s2649_s4 + $0x58] sm:$0xff] }
 0x37f   :  { %v2482_v5 = vadd.f32 %v739_v13, %v715_v32  ;;  %v1251_v32 = vsel %vm96_vm0, %v1239_v27, 0.0  ;;  %v1351_v13 = vld [vmem:[%s2649_s4 + $0x88] sm:$0xff] }
 0x380   :  { %v866_v18 = vrot.slane %v865_v59, 4 }
 0x381   :  { %v1082_v33 = vpop.permute.xlu1 %1081 }
 0x382   :  { %v867_v30 = vadd.f32 %v866_v18, %v865_v59  ;;  %v1354_v59 = vld [vmem:[%s2649_s4 + $0xa0] sm:$0xff]  ;;  %v1102_v18 = vmul.f32 %v1344_v51, %v1082_v33 }
 0x383   :  { %v1241_v56 = vmul.f32 %v1354_v59, %v2484_v46  ;;  %v1353_v46 = vld [vmem:[%s2649_s4 + $0x98] sm:$0xff] }
 0x384   :  { %v868_v10 = vrot.slane %v867_v30, 2  ;;  %v1116_v47 = vsel %vm96_vm0, %v1102_v18, 0.0 }
 0x386   :  { %v869_v14 = vadd.f32 %v868_v10, %v867_v30  ;;  %v1084_v52 = vpop.permute.xlu0 %1083  ;;  %v1090_v49 = vpop.permute.xlu2 %1089 }
 0x387   :  { %v1103_v22 = vmul.f32 %v1345_v62, %v1084_v52  ;;  %v1257_v52 = vsel %vm96_vm0, %v1241_v56, 0.0  ;;  %v1106_v7 = vmul.f32 %v1348_v55, %v1090_v49 }
 0x388   :  { %v870_v2 = vrot.slane %v869_v14, 1 }
 0x389   :  { %v1119_v9 = vsel %vm96_vm0, %v1103_v22, 0.0  ;;  %v1086_v10 = vpop.permute.xlu1 %1085 }
 0x38a   :  { %v871_v63 = vadd.f32 %v870_v2, %v869_v14  ;;  %v1355_v14 = vld [vmem:[%s2649_s4 + $0xa8] sm:$0xff] }
 0x38b   :  { %v1242_v57 = vmul.f32 %v1355_v14, %v1224_v31 }
 0x38c   :  { %v874_v48 = vadd.f32 1e-06, %v871_v63  ;;  %v889_v12 = vsub.f32 1.0, %v871_v63 }
 0x38e   :  { %v1226_v29 = vpop.permute.xlu0 %1225  ;;  %1627 = vlog2.f32 %v874_v48  ;;  %v891_v21 = vadd.f32 1e-06, %v889_v12  ;;  %v1357_v48 = vld [vmem:[%s2649_s4 + $0xb8] sm:$0xff]  ;;  %s1677_s4 = smov 65  }
 0x38f   :  { %v1243_v44 = vmul.f32 %v1356_v26, %v1226_v29  ;;  %v1260_v26 = vsel %vm96_vm0, %v1242_v57, 0.0  ;;  %v1128_v29 = vsel %vm96_vm0, %v1106_v7, 0.0 }
 0x390   :  { %1629 = vlog2.f32 %v891_v21 }
 0x391   :  { %v1263_v28 = vsel %vm96_vm0, %v1243_v44, 0.0  ;;  %v1228_v12 = vpop.permute.xlu1 %1227  ;;  %v1104_v44 = vmul.f32 %v1346_v42, %v1086_v10 }
 0x392   :  { %1264 = vadd.xlane.f32.xlu1 %v1263_v28  ;;  %v1244_v22 = vmul.f32 %v1357_v48, %v1228_v12 }
 0x393   :  { %v1122_v28 = vsel %vm96_vm0, %v1104_v44, 0.0 }
 0x394   :  { %v1628_v37 = vpop.eup %1627  ;;  %1108 = vadd.xlane.f32.xlu0 %v1107_v16  ;;  %1120 = vadd.xlane.f32.xlu2 %v1119_v9  ;;  %v1266_v25 = vsel %vm96_vm0, %v1244_v22, 0.0  ;;  %v927_v9 = vld [vmem:[%s2650_s5] sm:$0x3] }
 0x395   :  { %v878_v41 = vmul.f32 0.6931472, %v1628_v37 }
 0x396   :  { %v1630_v17 = vpop.eup %1629  ;;  %v1216_v40 = vpop.permute.xlu0 %1215 }
 0x397   :  { %v882_v6 = vsel %vm881_vm8, %v878_v41, %v876_v50  ;;  %v895_v43 = vmul.f32 0.6931472, %v1630_v17  ;;  %v1238_v30 = vmul.f32 %v1351_v13, %v1216_v40  ;;  %v984_v41 = vsub.f32 0.0, %v927_v9 }
 0x398   :  { %v713_v17 = vadd.f32 %v2486_v39, %v2167_v24  ;;  %v762_v24 = vmul.f32 0.33333334, %v2440_v45 }
 0x399   :  { %v898_v58 = vsel %vm881_vm8, %v895_v43, %v893_v19  ;;  %v1248_v2 = vsel %vm96_vm0, %v1238_v30, 0.0 }
 0x39a   :  { %1111 = vadd.xlane.f32.xlu1 %v1110_v38 }
 0x39c   :  { %1252 = vadd.xlane.f32.xlu0 %v1251_v32  ;;  %1126 = vadd.xlane.f32.xlu2 %v1125_v3 }
 0x39e   :  { %v1220_v63 = vpop.permute.xlu0 %1219 }
 0x39f   :  { %v1240_v62 = vmul.f32 %v1353_v46, %v1220_v63 }
 0x3a1   :  { %v1254_v21 = vsel %vm96_vm0, %v1240_v62, 0.0 }
 0x3a2   :  { %1117 = vadd.xlane.f32.xlu1 %v1116_v47  ;;  %v1349_v47 = vld [vmem:[%s2650_s5 + $0x2] sm:$0x3] }
 0x3a3   :  { %v1131_v7 = vsub.f32 0.0, %v1349_v47 }
 0x3a4   :  { %1258 = vadd.xlane.f32.xlu0 %v1257_v52  ;;  %1249 = vadd.xlane.f32.xlu2 %v1248_v2 }
 0x3aa   :  { %1261 = vadd.xlane.f32.xlu1 %v1260_v26 }
 0x3ac   :  { %1129 = vadd.xlane.f32.xlu2 %v1128_v29  ;;  %1255 = vadd.xlane.f32.xlu0 %v1254_v21 }
 0x3b1   :  { %v971_v8 = vpop.xlane.xlu2 %970 }
 0x3b2   :  { %1267 = vadd.xlane.f32.xlu1 %v1266_v25  ;;  %v1005_v37 = vperm.slane %v971_v8, %v2552_v1 }
 0x3b4   :  { %1123 = vadd.xlane.f32.xlu0 %v1122_v28  ;;  %v1007_v27 = vsel %vm1006_vm11, %v1005_v37, %v2370_v0 }
 0x3b7   :  { %v805_v34 = vpop.permute.xlu1 %804 }
 0x3b8   :  { %829 = vst.msk [vmem:[#allocation2] sm:$0xff] %vm828_vm9, %v805_v34  ;;  %v872_v34 = vld [vmem:[%s2648_s3] sm:$0x3] }
 0x3b9   :  { %838 = vst.msk [vmem:[#allocation2] sm:$0xff] %vm837_vm10, %v1676_v35  ;;  %v887_v37 = vsub.f32 1.0, %v872_v34 }
 0x3c4   :  { %883 = vrot.lane.b32.xlu2 %v882_v6, %s1677_s4  ;;  %v753_v6 = vadd.f32 %v2472_v11, %v713_v17 }
 0x3c5   :  { %v807_v16 = vpop.permute.xlu2 %806 }
 0x3c6   :  { %830 = vst.msk [vmem:[#allocation2 + $0x8] sm:$0xff] %vm828_vm9, %v807_v16  ;;  %v761_v43 = vmul.f32 0.33333334, %v753_v6 }
 0x3c7   :  { %839 = vst.msk [vmem:[#allocation2 + $0x8] sm:$0xff] %vm837_vm10, %v1676_v35 }
 0x3c8   :  { %899 = vrot.lane.b32.xlu0 %v898_v58, %s1677_s4 }
 0x3c9   :  { %v983_v15 = vpop.xlane.xlu0 %982 }
 0x3ca   :  { %v1013_v50 = vperm.slane %v983_v15, %v2552_v1 }
 0x3cc   :  { %v1014_v33 = vsel %vm1006_vm11, %v1013_v50, %v2363_v20  ;;  %810 = vrot.lane.b32.xlu2 %v759_v54, %s1675_s19  ;;  %v763_v20 = vmul.f32 0.33333334, %v2482_v5 }
 0x3cd   :  { %v1015_v23 = vsel %vm881_vm8, %v1014_v33, %v1007_v27 }
 0x3ce   :  { %v1017_v53 = vmul.f32 %v1015_v23, %v984_v41 }
 0x3d0   :  { %v1019_v19 = vsel %vm1018_vm12, %v1017_v53, 0.0  ;;  %v1358_v53 = vld [vmem:[%s2650_s5 + $0x4] sm:$0x3]  ;;  %s1678_s5 = smov [#allocation2]  }
 0x3d1   :  { %1020 = vadd.xlane.f32.xlu1 %v1019_v19 }
 0x3d4   :  { %814 = vrot.lane.b32.xlu2 %v761_v43, %s1675_s19 }
 0x3dc   :  { %816 = vrot.lane.b32.xlu2 %v762_v24, %s1675_s19  ;;  %v809_v0 = vpop.permute.xlu0 %808 }
 0x3dd   :  { %831 = vst.msk [vmem:[#allocation2 + $0x10] sm:$0xff] %vm828_vm9, %v809_v0 }
 0x3de   :  { %840 = vst.msk [vmem:[#allocation2 + $0x10] sm:$0xff] %vm837_vm10, %v1676_v35 }
 0x3e2   :  { %v1247_v11 = vpop.xlane.xlu1 %1246 }
 0x3e3   :  { %v1278_v15 = vperm.slane %v1247_v11, %v2341_v36  ;;  %v1269_v11 = vsub.f32 0.0, %v1358_v53 }
 0x3e4   :  { %818 = vrot.lane.b32.xlu2 %v763_v20, %s1675_s19 }
 0x3ea   :  { %v1115_v39 = vpop.xlane.xlu1 %1114 }
 0x3eb   :  { %v1143_v49 = vperm.slane %v1115_v39, %v2349_v61 }
 0x405   :  { %v1265_v31 = vpop.xlane.xlu1 %1264 }
 0x406   :  { %v1288_v41 = vperm.slane %v1265_v31, %v2349_v61  ;;  %v760_v31 = vmul.f32 0.33333334, %v2448_v4 }
 0x407   :  { %v1121_v38 = vpop.xlane.xlu2 %1120  ;;  %v1109_v58 = vpop.xlane.xlu0 %1108 }
 0x408   :  { %v1140_v30 = vperm.slane %v1109_v58, %v2341_v36  ;;  %v1147_v14 = vperm.slane %v1121_v38, %v2341_v36 }
 0x40d   :  { %v1112_v3 = vpop.xlane.xlu1 %1111 }
 0x40e   :  { %v1141_v56 = vperm.slane %v1112_v3, %v2346_v60 }
 0x40f   :  { %v1127_v51 = vpop.xlane.xlu2 %1126  ;;  %v1253_v40 = vpop.xlane.xlu0 %1252 }
 0x410   :  { %v1142_v52 = vsel %vm998_vm6, %v1141_v56, %v1140_v30  ;;  %v1150_v46 = vperm.slane %v1127_v51, %v2349_v61  ;;  %v1281_v6 = vperm.slane %v1253_v40, %v2349_v61 }
 0x411   :  { %v1144_v62 = vsel %vm1002_vm7, %v1143_v49, %v1142_v52 }
 0x415   :  { %v1118_v18 = vpop.xlane.xlu1 %1117 }
 0x416   :  { %v1145_v2 = vperm.slane %v1118_v18, %v2552_v1 }
 0x417   :  { %v1250_v45 = vpop.xlane.xlu2 %1249  ;;  %v1259_v32 = vpop.xlane.xlu0 %1258 }
 0x418   :  { %v1146_v48 = vsel %vm1006_vm11, %v1145_v2, %v1144_v62  ;;  %v1279_v8 = vperm.slane %v1250_v45, %v2346_v60  ;;  %v1285_v16 = vperm.slane %v1259_v32, %v2341_v36 }
 0x41d   :  { %v1262_v12 = vpop.xlane.xlu1 %1261 }
 0x41e   :  { %v1286_v25 = vperm.slane %v1262_v12, %v2346_v60 }
 0x41f   :  { %v1130_v59 = vpop.xlane.xlu2 %1129  ;;  %v1256_v13 = vpop.xlane.xlu0 %1255 }
 0x420   :  { %v1152_v63 = vperm.slane %v1130_v59, %v2552_v1  ;;  %v1287_v54 = vsel %vm998_vm6, %v1286_v25, %v1285_v16  ;;  %v1283_v27 = vperm.slane %v1256_v13, %v2552_v1 }
 0x421   :  { %v1289_v36 = vsel %vm1002_vm7, %v1288_v41, %v1287_v54 }
 0x425   :  { %v1268_v28 = vpop.xlane.xlu1 %1267 }
 0x426   :  { %v1290_v50 = vperm.slane %v1268_v28, %v2552_v1 }
 0x427   :  { %v884_v5 = vpop.permute.xlu2 %883  ;;  %v1124_v10 = vpop.xlane.xlu0 %1123 }
 0x428   :  { %v1148_v55 = vperm.slane %v1124_v10, %v2346_v60  ;;  %v1280_v60 = vsel %vm998_vm6, %v1279_v8, %v1278_v15  ;;  %v886_v33 = vmul.f32 %v884_v5, %v872_v34  ;;  %v1291_v19 = vsel %vm1006_vm11, %v1290_v50, %v1289_v36 }
 0x429   :  { %v1282_v24 = vsel %vm1002_vm7, %v1281_v6, %v1280_v60 }
 0x42a   :  { %v1149_v57 = vsel %vm998_vm6, %v1148_v55, %v1147_v14  ;;  %v1284_v0 = vsel %vm1006_vm11, %v1283_v27, %v1282_v24 }
 0x42b   :  { %v1151_v26 = vsel %vm1002_vm7, %v1150_v46, %v1149_v57  ;;  %v1292_v61 = vsel %vm881_vm8, %v1291_v19, %v1284_v0 }
 0x42c   :  { %v1153_v29 = vsel %vm1006_vm11, %v1152_v63, %v1151_v26  ;;  %v1294_v39 = vmul.f32 %v1292_v61, %v1269_v11 }
 0x42d   :  { %v1154_v21 = vsel %vm881_vm8, %v1153_v29, %v1146_v48 }
 0x42e   :  { %v1156_v42 = vmul.f32 %v1154_v21, %v1131_v7  ;;  %v1295_v58 = vsel %vm1018_vm12, %v1294_v39, 0.0 }
 0x42f   :  { %v811_v22 = vpop.permute.xlu2 %810 }
 0x430   :  { %832 = vst.msk [vmem:[#allocation2 + $0x18] sm:$0xff] %vm828_vm9, %v811_v22  ;;  %v1157_v44 = vsel %vm1018_vm12, %v1156_v42, 0.0 }
 0x431   :  { %841 = vst.msk [vmem:[#allocation2 + $0x18] sm:$0xff] %vm837_vm10, %v1676_v35  ;;  %1158 = vadd.xlane.f32.xlu0 %v1157_v44 }
 0x437   :  { %v815_v9 = vpop.permute.xlu2 %814 }
 0x438   :  { %834 = vst.msk [vmem:[#allocation2 + $0x28] sm:$0xff] %vm828_vm9, %v815_v9 }
 0x439   :  { %843 = vst.msk [vmem:[#allocation2 + $0x28] sm:$0xff] %vm837_vm10, %v1676_v35 }
 0x43a   :  { %v900_v17 = vpop.permute.xlu0 %899 }
 0x43b   :  { %v902_v23 = vmul.f32 %v900_v17, %v887_v37 }
 0x43d   :  { %v903_v43 = vadd.f32 %v902_v23, %v886_v33 }
 0x43f   :  { %v817_v20 = vpop.permute.xlu2 %816  ;;  %v905_v1 = vsel %vm904_vm13, %v903_v43, 0.0 }
 0x440   :  { %835 = vst.msk [vmem:[#allocation2 + $0x30] sm:$0xff] %vm828_vm9, %v817_v20  ;;  %906 = vadd.xlane.f32.xlu1 %v905_v1 }
 0x441   :  { %844 = vst.msk [vmem:[#allocation2 + $0x30] sm:$0xff] %vm837_vm10, %v1676_v35 }
 0x444   :  { %v1021_v51 = vpop.xlane.xlu1 %1020 }
 0x445   :  { %v1022_v45 = vrot.slane %v1021_v51, 4 }
 0x447   :  { %v819_v38 = vpop.permute.xlu2 %818  ;;  %v1023_v3 = vadd.f32 %v1022_v45, %v1021_v51 }
 0x448   :  { %836 = vst.msk [vmem:[#allocation2 + $0x38] sm:$0xff] %vm828_vm9, %v819_v38  ;;  %1296 = vadd.xlane.f32.xlu1 %v1295_v58 }
 0x449   :  { %845 = vst.msk [vmem:[#allocation2 + $0x38] sm:$0xff] %vm837_vm10, %v1676_v35  ;;  %v1024_v13 = vrot.slane %v1023_v3, 2 }
 0x44b   :  { %v1025_v10 = vadd.f32 %v1024_v13, %v1023_v3 }
 0x44d   :  { %v1026_v55 = vrot.slane %v1025_v10, 1 }
 0x44f   :  { %v1027_v7 = vadd.f32 %v1026_v55, %v1025_v10 }
 0x461   :  { %812 = vrot.lane.b32.xlu1 %v760_v31, %s1675_s19  ;;  %s1312_s19 = sshll.u32 %s1678_s5, 4  ;;  %s1313_s19 = int_to_ptr.vmem [resolvable:$true] %s1312_s19 }
 0x4a4   :  { %v1159_v40 = vpop.xlane.xlu0 %1158 }
 0x4a5   :  { %v1160_v32 = vrot.slane %v1159_v40, 4 }
 0x4a7   :  { %v1161_v59 = vadd.f32 %v1160_v32, %v1159_v40 }
 0x4a9   :  { %v1162_v56 = vrot.slane %v1161_v59, 2 }
 0x4ab   :  { %v1163_v47 = vadd.f32 %v1162_v56, %v1161_v59 }
 0x4ad   :  { %v1164_v46 = vrot.slane %v1163_v47, 1 }
 0x4af   :  { %v1165_v26 = vadd.f32 %v1164_v46, %v1163_v47 }
 0x4b3   :  { %v907_v18 = vpop.xlane.xlu1 %906 }
 0x4b4   :  { %v908_v30 = vrot.slane %v907_v18, 4 }
 0x4b6   :  { %v909_v5 = vadd.f32 %v908_v30, %v907_v18 }
 0x4b8   :  { %v910_v14 = vrot.slane %v909_v5, 2 }
 0x4ba   :  { %v911_v52 = vadd.f32 %v910_v14, %v909_v5 }
 0x4bb   :  { %v1297_v2 = vpop.xlane.xlu1 %1296 }
 0x4bc   :  { %v1298_v4 = vrot.slane %v1297_v2, 4  ;;  %v912_v49 = vrot.slane %v911_v52, 1 }
 0x4be   :  { %v1299_v63 = vadd.f32 %v1298_v4, %v1297_v2  ;;  %v913_v57 = vadd.f32 %v912_v49, %v911_v52 }
 0x4c0   :  { %v1300_v62 = vrot.slane %v1299_v63, 2  ;;  %1407 = vpush %v913_v57 }
 0x4c1   :  { %1409 = vpush %v1027_v7 }
 0x4c2   :  { %1411 = vpush %v1165_v26  ;;  %v1301_v48 = vadd.f32 %v1300_v62, %v1299_v63 }
 0x4c4   :  { %v1302_v12 = vrot.slane %v1301_v48, 1 }
 0x4c6   :  { %v1303_v29 = vadd.f32 %v1302_v12, %v1301_v48 }
 0x4c8   :  { %1413 = vpush %v1303_v29 }
 0x4d3   :  { %v813_v21 = vpop.permute.xlu1 %812 }
 0x4d4   :  { %833 = vst.msk [vmem:[#allocation2 + $0x20] sm:$0xff] %vm828_vm9, %v813_v21 }
 0x4d5   :  { %842 = vst.msk [vmem:[#allocation2 + $0x20] sm:$0xff] %vm837_vm10, %v1676_v35 }
 0x4d6   :  { %1320 = dma.vmem_to_hbm [thread:$0]  %s1313_s19, 1024, %s1315_s13, [#allocation3], %s1679_s14, %s1679_s14, %s1680_s15  }
 0x4f1   :  { %s1408_s16 = spop %1407 }
 0x4f2   :  { %s915_s1 = ssub.f32 0.0, %s1408_s16  ;;  %s1410_s17 = spop %1409 }
 0x4f3   :  { %s1029_s18 = smul.f32 0.015625, %s1410_s17  ;;  %s1412_s20 = spop %1411 }
 0x4f4   :  { %s916_s21 = smul.f32 0.5, %s915_s1 }
 0x4f5   :  { %1031 = sst [smem:[#allocation5 + $0x1]] %s1029_s18  ;;  %s1167_s22 = smul.f32 0.015625, %s1412_s20 }
 0x4f6   :  { %918 = sst [smem:[#allocation5]] %s916_s21 }
 0x4f7   :  { %1169 = sst [smem:[#allocation5 + $0x2]] %s1167_s22 }
 0x4f9   :  { %s1414_s25 = spop %1413 }
 0x4fa   :  { %s1305_s26 = smul.f32 0.015625, %s1414_s25 }
 0x4fc   :  { %1307 = sst [smem:[#allocation5 + $0x3]] %s1305_s26 }
 0x4fd   :  { %1329 = dma.smem_to_hbm %s1681_s0, 16, %s1327_s24, [#allocation4]  }
 0x4fe   :  { %1667 = dma.done.wait [#allocation3], 1024  }
 0x4ff   :  { %1668 = vsyncadd [#allocation3], 4294966272 }
 0x500   :  { %1669 = dma.done.wait [#allocation4], 16  }
 0x501   :  { %1670 = vsyncadd [#allocation4], 4294967280 }
 0x502   :  { %1338 = sfence }
 0x503   :  { %1339 = vsyncpa [#allocation3], 1 }
 0x504   :  { %1340 = vsyncpa [#allocation4], 1 }

</bundles_post_ra>
